<compile_context>
chip_gen: v7x
topology: tpu7x:2x2x1
jax: 0.10.0
libtpu: 0.0.40
codegen_flags: <defaults>
</compile_context>

<pallas_src>
import functools

import jax
import jax.numpy as jnp
from jax.experimental import pallas as pl
from jax.experimental.pallas import tpu as pltpu


# ---------------------------------------------------------------------------
# Kernel
# ---------------------------------------------------------------------------
def _value_net_kernel(
    src_ref, dst_ref, dstrow_ref, x_ref,
    w_in_ref, b_in_ref,
    w_m1i_ref, w_m1j_ref, b_m1_ref, w_m2_ref, b_m2_ref,
    w_u1h_ref, w_u1a_ref, b_u1_ref, w_u2_ref, b_u2_ref,
    w_pred_ref, b_pred_ref,
    out_ref,
    *, num_layers, compute_dtype,
):
    N = x_ref.shape[0]
    E = src_ref.shape[0]
    f32 = jnp.float32
    cdt = compute_dtype

    # lin_in:  [N, in_dim] @ [in_dim, emb] + [1, emb]   (tiny, kept in fp32)
    h = jnp.dot(x_ref[...], w_in_ref[...], preferred_element_type=f32) + b_in_ref[...]

    # One-hot gather / scatter matrices, built ONCE before the layer loop.
    src = src_ref[...]          # [E, 1]  source  j  (edge_index[0])
    dst = dst_ref[...]          # [E, 1]  target  i  (edge_index[1], scatter index)
    dst_row = dstrow_ref[...]   # [1, E]  target, lane-major (for the scatter matrix)

    iota_en = jax.lax.broadcasted_iota(jnp.int32, (E, N), 1)
    gather_src = (iota_en == src).astype(cdt)          # [E, N]  h_j = gather_src @ h
    gather_dst = (iota_en == dst).astype(cdt)          # [E, N]  h_i = gather_dst @ h
    iota_ne = jax.lax.broadcasted_iota(jnp.int32, (N, E), 0)
    scatter_dst = (iota_ne == dst_row).astype(cdt)     # [N, E]  aggr = scatter_dst @ m

    for l in range(num_layers):                        # num_layers is static (=4)
        h_c = h.astype(cdt)                            # MXU operand copy (fp32 master kept)

        # --- mlp_msg( cat([h_i, h_j]) ), first Linear pre-transformed per node ---------
        # cat([h_i,h_j]) @ Wm1^T == gather_dst @ (h @ Wm1_top) + gather_src @ (h @ Wm1_bot)
        ti = jnp.dot(h_c, w_m1i_ref[l], preferred_element_type=f32)          # [N, emb]
        tj = jnp.dot(h_c, w_m1j_ref[l], preferred_element_type=f32)          # [N, emb]
        m = (jnp.dot(gather_dst, ti.astype(cdt), preferred_element_type=f32)
             + jnp.dot(gather_src, tj.astype(cdt), preferred_element_type=f32)
             + b_m1_ref[l])                                                   # [E, emb]
        m = jnp.maximum(m, 0.0)
        m = jnp.dot(m.astype(cdt), w_m2_ref[l], preferred_element_type=f32) + b_m2_ref[l]
        m = jnp.maximum(m, 0.0)

        # --- scatter-add over destination nodes: [N, E] @ [E, emb] -> [N, emb] ---------
        aggr = jnp.dot(scatter_dst, m.astype(cdt), preferred_element_type=f32)

        # --- mlp_upd( cat([h, aggr]) ), first Linear split (no lane concat) ------------
        u = (jnp.dot(h_c, w_u1h_ref[l], preferred_element_type=f32)
             + jnp.dot(aggr.astype(cdt), w_u1a_ref[l], preferred_element_type=f32)
             + b_u1_ref[l])                                                   # [N, emb]
        u = jnp.maximum(u, 0.0)
        u = jnp.dot(u.astype(cdt), w_u2_ref[l], preferred_element_type=f32) + b_u2_ref[l]
        u = jnp.maximum(u, 0.0)

        # Residual connection:  emb = emb + conv(emb, edge_index)   (fp32)
        h = h + u

    # global_mean_pool with data.batch == zeros -> single-graph mean over all nodes.
    h_graph = jnp.sum(h, axis=0, keepdims=True) * (1.0 / N)                   # [1, emb]

    # lin_pred (tiny, fp32)
    out_ref[...] = (jnp.dot(h_graph, w_pred_ref[...], preferred_element_type=f32)
                    + b_pred_ref[...])


# ---------------------------------------------------------------------------
# Parameter init (deterministic, PyTorch-Linear-style uniform init).
# ---------------------------------------------------------------------------
def _linear_init(key, fan_in, fan_out):
    kw, kb = jax.random.split(key)
    bound = 1.0 / float(fan_in) ** 0.5
    w = jax.random.uniform(kw, (fan_out, fan_in), jnp.float32, -bound, bound)  # torch [out, in]
    b = jax.random.uniform(kb, (fan_out,), jnp.float32, -bound, bound)
    return w, b


def init_value_network_params(key, num_layers=4, emb_dim=64, in_dim=7, out_dim=1):
    keys = jax.random.split(key, 2 + 4 * num_layers)
    params = {
        'lin_in': _linear_init(keys[0], in_dim, emb_dim),
        'lin_pred': _linear_init(keys[1], emb_dim, out_dim),
        'layers': [],
    }
    for l in range(num_layers):
        base = 2 + 4 * l
        params['layers'].append({
            'msg1': _linear_init(keys[base + 0], 2 * emb_dim, emb_dim),
            'msg2': _linear_init(keys[base + 1], emb_dim, emb_dim),
            'upd1': _linear_init(keys[base + 2], 2 * emb_dim, emb_dim),
            'upd2': _linear_init(keys[base + 3], emb_dim, emb_dim),
        })
    return params


# ---------------------------------------------------------------------------
# One-time weight packing (hoisted out of the per-call forward).
# Layouts: y = x @ W + b, i.e. weights stored as [in, out]; layer weights stacked on
# axis 0.  The 2*emb-input Linears are split into their two emb-input halves so the
# kernel never has to concatenate along the lane axis.  Weights go to compute_dtype
# (MXU operands); biases stay fp32.
# ---------------------------------------------------------------------------
def pack_value_network_params(params, compute_dtype=jnp.bfloat16):
    W_in, b_in = params['lin_in']
    emb = W_in.shape[0]
    W_p, b_p = params['lin_pred']
    out_dim = W_p.shape[0]

    def stack_w(name):
        return jnp.stack([lyr[name][0].T for lyr in params['layers']], 0).astype(compute_dtype)

    def stack_w_split(name):
        # torch weight is [out=emb, in=2*emb]; first emb input cols act on (h_i | h),
        # last emb input cols act on (h_j | aggr).
        top = jnp.stack([lyr[name][0][:, :emb].T for lyr in params['layers']], 0)
        bot = jnp.stack([lyr[name][0][:, emb:].T for lyr in params['layers']], 0)
        return top.astype(compute_dtype), bot.astype(compute_dtype)

    def stack_b(name):
        return jnp.stack([lyr[name][1].reshape(1, -1) for lyr in params['layers']],
                         0).astype(jnp.float32)

    w_m1i, w_m1j = stack_w_split('msg1')
    w_u1h, w_u1a = stack_w_split('upd1')

    return {
        'w_in': W_in.T.astype(jnp.float32),                 # [in_dim, emb]
        'b_in': b_in.reshape(1, emb).astype(jnp.float32),   # [1, emb]
        'w_m1i': w_m1i,                                     # [L, emb, emb]  (h_i half)
        'w_m1j': w_m1j,                                     # [L, emb, emb]  (h_j half)
        'b_m1': stack_b('msg1'),                            # [L, 1, emb]
        'w_m2': stack_w('msg2'),                            # [L, emb, emb]
        'b_m2': stack_b('msg2'),
        'w_u1h': w_u1h,                                     # [L, emb, emb]  (h half)
        'w_u1a': w_u1a,                                     # [L, emb, emb]  (aggr half)
        'b_u1': stack_b('upd1'),
        'w_u2': stack_w('upd2'),
        'b_u2': stack_b('upd2'),
        'w_pred': W_p.T.astype(jnp.float32),                # [emb, out_dim]
        'b_pred': b_p.reshape(1, out_dim).astype(jnp.float32),
    }


# ---------------------------------------------------------------------------
# Forward: minimal per-call glue (edge split + pallas_call), all under one jit.
# ---------------------------------------------------------------------------
@jax.jit
def value_network_forward(packed, x, edge_index):
    E = edge_index.shape[1]
    src_col = edge_index[0].reshape(E, 1).astype(jnp.int32)   # j  (source)
    dst_col = edge_index[1].reshape(E, 1).astype(jnp.int32)   # i  (target / scatter index)
    dst_row = edge_index[1].reshape(1, E).astype(jnp.int32)

    num_layers = packed['w_m1i'].shape[0]
    compute_dtype = packed['w_m1i'].dtype
    out_dim = packed['w_pred'].shape[1]

    kernel = functools.partial(_value_net_kernel,
                               num_layers=num_layers,
                               compute_dtype=compute_dtype)

    vmem = pl.BlockSpec(memory_space=pltpu.MemorySpace.VMEM)
    out = pl.pallas_call(
        kernel,
        out_shape=jax.ShapeDtypeStruct((1, out_dim), jnp.float32),
        in_specs=[vmem] * 18,
        out_specs=vmem,
    )(src_col, dst_col, dst_row, x.astype(jnp.float32),
      packed['w_in'], packed['b_in'],
      packed['w_m1i'], packed['w_m1j'], packed['b_m1'], packed['w_m2'], packed['b_m2'],
      packed['w_u1h'], packed['w_u1a'], packed['b_u1'], packed['w_u2'], packed['b_u2'],
      packed['w_pred'], packed['b_pred'])
    return out.reshape(-1)                                    # matches out.view(-1)


# ---------------------------------------------------------------------------
# Pure-JAX reference (mirrors the PyTorch forward semantics exactly, fp32).
# ---------------------------------------------------------------------------
def value_network_reference(params, x, edge_index):
    W_in, b_in = params['lin_in']
    h = x @ W_in.T + b_in
    src = edge_index[0]
    dst = edge_index[1]
    for layer in params['layers']:
        Wm1, bm1 = layer['msg1']; Wm2, bm2 = layer['msg2']
        Wu1, bu1 = layer['upd1']; Wu2, bu2 = layer['upd2']
        h_i = h[dst]
        h_j = h[src]
        m = jax.nn.relu(jnp.concatenate([h_i, h_j], -1) @ Wm1.T + bm1)
        m = jax.nn.relu(m @ Wm2.T + bm2)
        aggr = jnp.zeros_like(h).at[dst].add(m)
        u = jax.nn.relu(jnp.concatenate([h, aggr], -1) @ Wu1.T + bu1)
        u = jax.nn.relu(u @ Wu2.T + bu2)
        h = h + u
    h_graph = jnp.mean(h, axis=0, keepdims=True)
    W_p, b_p = params['lin_pred']
    return (h_graph @ W_p.T + b_p).reshape(-1)


if __name__ == "__main__":
    key = jax.random.PRNGKey(0)
    k_param, k_x, k_e = jax.random.split(key, 3)

    N, E, in_dim, emb_dim, num_layers, out_dim = 8, 16, 7, 64, 4, 1
    params = init_value_network_params(k_param, num_layers, emb_dim, in_dim, out_dim)
    x = jax.random.normal(k_x, (N, in_dim), jnp.float32)               # data.x
    edge_index = jax.random.randint(k_e, (2, E), 0, N, jnp.int32)      # data.edge_index

    ref = value_network_reference(params, x, edge_index)

    # Strict fp32 check (kernel MXU operands in fp32).
    packed_f32 = pack_value_network_params(params, compute_dtype=jnp.float32)
    out_f32 = jax.block_until_ready(value_network_forward(packed_f32, x, edge_index))
    assert out_f32.shape == (out_dim,)
    assert jnp.allclose(out_f32, ref, atol=1e-4, rtol=1e-4), (out_f32, ref)

    # Fast path: bf16 MXU operands with fp32 accumulation (default for v5e/v6e/v7x).
    packed_bf16 = pack_value_network_params(params, compute_dtype=jnp.bfloat16)
    out_bf16 = jax.block_until_ready(value_network_forward(packed_bf16, x, edge_index))
    assert out_bf16.shape == (out_dim,)
    assert jnp.allclose(out_bf16, ref, atol=5e-2, rtol=5e-2), (out_bf16, ref)

    print("KERNEL_OK")
</pallas_src>

<mosaic_0001>
module attributes {stable_mosaic.version = 11 : i64} {
  func.func @_value_net_kernel(%arg0: memref<16x1xi32, #tpu.memory_space<vmem>>, %arg1: memref<16x1xi32, #tpu.memory_space<vmem>>, %arg2: memref<1x16xi32, #tpu.memory_space<vmem>>, %arg3: memref<8x7xf32, #tpu.memory_space<vmem>>, %arg4: memref<7x64xf32, #tpu.memory_space<vmem>>, %arg5: memref<1x64xf32, #tpu.memory_space<vmem>>, %arg6: memref<4x64x64xf32, #tpu.memory_space<vmem>>, %arg7: memref<4x64x64xf32, #tpu.memory_space<vmem>>, %arg8: memref<4x1x64xf32, #tpu.memory_space<vmem>>, %arg9: memref<4x64x64xf32, #tpu.memory_space<vmem>>, %arg10: memref<4x1x64xf32, #tpu.memory_space<vmem>>, %arg11: memref<4x64x64xf32, #tpu.memory_space<vmem>>, %arg12: memref<4x64x64xf32, #tpu.memory_space<vmem>>, %arg13: memref<4x1x64xf32, #tpu.memory_space<vmem>>, %arg14: memref<4x64x64xf32, #tpu.memory_space<vmem>>, %arg15: memref<4x1x64xf32, #tpu.memory_space<vmem>>, %arg16: memref<64x1xf32, #tpu.memory_space<vmem>>, %arg17: memref<1x1xf32, #tpu.memory_space<vmem>>, %arg18: memref<1x1xf32, #tpu.memory_space<vmem>>) attributes {dimension_semantics = [], scalar_prefetch = 0 : i64, scratch_operands = 0 : i64, tpu.core_type = #tpu.core_type<tc>} {
    %c0 = arith.constant 0 : index
    %c0_0 = arith.constant 0 : index
    %0 = vector.load %arg3[%c0, %c0_0] : memref<8x7xf32, #tpu.memory_space<vmem>>, vector<8x7xf32>
    %c0_1 = arith.constant 0 : index
    %c0_2 = arith.constant 0 : index
    %1 = vector.load %arg4[%c0_1, %c0_2] : memref<7x64xf32, #tpu.memory_space<vmem>>, vector<7x64xf32>
    %cst = arith.constant dense<0.000000e+00> : vector<8x64xf32>
    %2 = tpu.matmul %0, %1, %cst {dimension_numbers = #tpu.dot_dimension_numbers<[1], [0], [0], [1], [0, 0, 1, 1], [], []>} : vector<8x7xf32>, vector<7x64xf32>, vector<8x64xf32> -> vector<8x64xf32>
    %c0_3 = arith.constant 0 : index
    %c0_4 = arith.constant 0 : index
    %3 = vector.load %arg5[%c0_3, %c0_4] : memref<1x64xf32, #tpu.memory_space<vmem>>, vector<1x64xf32>
    %4 = vector.broadcast %3 : vector<1x64xf32> to vector<8x64xf32>
    %5 = arith.addf %2, %4 : vector<8x64xf32>
    %c0_5 = arith.constant 0 : index
    %c0_6 = arith.constant 0 : index
    %6 = vector.load %arg0[%c0_5, %c0_6] : memref<16x1xi32, #tpu.memory_space<vmem>>, vector<16x1xi32>
    %c0_7 = arith.constant 0 : index
    %c0_8 = arith.constant 0 : index
    %7 = vector.load %arg1[%c0_7, %c0_8] : memref<16x1xi32, #tpu.memory_space<vmem>>, vector<16x1xi32>
    %c0_9 = arith.constant 0 : index
    %c0_10 = arith.constant 0 : index
    %8 = vector.load %arg2[%c0_9, %c0_10] : memref<1x16xi32, #tpu.memory_space<vmem>>, vector<1x16xi32>
    %9 = tpu.iota {dimensions = array<i32: 1>} : vector<16x8xi32>
    %10 = vector.broadcast %6 : vector<16x1xi32> to vector<16x8xi32>
    %11 = arith.cmpi eq, %9, %10 : vector<16x8xi32>
    %12 = arith.extui %11 : vector<16x8xi1> to vector<16x8xi32>
    %13 = arith.sitofp %12 : vector<16x8xi32> to vector<16x8xf32>
    %14 = vector.broadcast %7 : vector<16x1xi32> to vector<16x8xi32>
    %15 = arith.cmpi eq, %9, %14 : vector<16x8xi32>
    %16 = arith.extui %15 : vector<16x8xi1> to vector<16x8xi32>
    %17 = arith.sitofp %16 : vector<16x8xi32> to vector<16x8xf32>
    %18 = tpu.iota {dimensions = array<i32: 0>} : vector<8x16xi32>
    %19 = vector.broadcast %8 : vector<1x16xi32> to vector<8x16xi32>
    %20 = arith.cmpi eq, %18, %19 : vector<8x16xi32>
    %21 = arith.extui %20 : vector<8x16xi1> to vector<8x16xi32>
    %22 = arith.sitofp %21 : vector<8x16xi32> to vector<8x16xf32>
    %c0_11 = arith.constant 0 : index
    %c0_12 = arith.constant 0 : index
    %c0_13 = arith.constant 0 : index
    %23 = vector.load %arg6[%c0_11, %c0_12, %c0_13] : memref<4x64x64xf32, #tpu.memory_space<vmem>>, vector<1x64x64xf32>
    %24 = vector.shape_cast %23 : vector<1x64x64xf32> to vector<64x64xf32>
    %cst_14 = arith.constant dense<0.000000e+00> : vector<8x64xf32>
    %25 = tpu.matmul %5, %24, %cst_14 {dimension_numbers = #tpu.dot_dimension_numbers<[1], [0], [0], [1], [0, 0, 1, 1], [], []>} : vector<8x64xf32>, vector<64x64xf32>, vector<8x64xf32> -> vector<8x64xf32>
    %c0_15 = arith.constant 0 : index
    %c0_16 = arith.constant 0 : index
    %c0_17 = arith.constant 0 : index
    %26 = vector.load %arg7[%c0_15, %c0_16, %c0_17] : memref<4x64x64xf32, #tpu.memory_space<vmem>>, vector<1x64x64xf32>
    %27 = vector.shape_cast %26 : vector<1x64x64xf32> to vector<64x64xf32>
    %cst_18 = arith.constant dense<0.000000e+00> : vector<8x64xf32>
    %28 = tpu.matmul %5, %27, %cst_18 {dimension_numbers = #tpu.dot_dimension_numbers<[1], [0], [0], [1], [0, 0, 1, 1], [], []>} : vector<8x64xf32>, vector<64x64xf32>, vector<8x64xf32> -> vector<8x64xf32>
    %cst_19 = arith.constant dense<0.000000e+00> : vector<16x64xf32>
    %29 = tpu.matmul %17, %25, %cst_19 {dimension_numbers = #tpu.dot_dimension_numbers<[1], [0], [0], [1], [0, 0, 1, 1], [], []>} : vector<16x8xf32>, vector<8x64xf32>, vector<16x64xf32> -> vector<16x64xf32>
    %cst_20 = arith.constant dense<0.000000e+00> : vector<16x64xf32>
    %30 = tpu.matmul %13, %28, %cst_20 {dimension_numbers = #tpu.dot_dimension_numbers<[1], [0], [0], [1], [0, 0, 1, 1], [], []>} : vector<16x8xf32>, vector<8x64xf32>, vector<16x64xf32> -> vector<16x64xf32>
    %31 = arith.addf %29, %30 : vector<16x64xf32>
    %c0_21 = arith.constant 0 : index
    %c0_22 = arith.constant 0 : index
    %c0_23 = arith.constant 0 : index
    %32 = vector.load %arg8[%c0_21, %c0_22, %c0_23] : memref<4x1x64xf32, #tpu.memory_space<vmem>>, vector<1x1x64xf32>
    %33 = vector.shape_cast %32 : vector<1x1x64xf32> to vector<1x64xf32>
    %34 = vector.broadcast %33 : vector<1x64xf32> to vector<16x64xf32>
    %35 = arith.addf %31, %34 : vector<16x64xf32>
    %cst_24 = arith.constant 0.000000e+00 : f32
    %36 = vector.broadcast %cst_24 : f32 to vector<16x64xf32>
    %37 = arith.maximumf %35, %36 : vector<16x64xf32>
    %c0_25 = arith.constant 0 : index
    %c0_26 = arith.constant 0 : index
    %c0_27 = arith.constant 0 : index
    %38 = vector.load %arg9[%c0_25, %c0_26, %c0_27] : memref<4x64x64xf32, #tpu.memory_space<vmem>>, vector<1x64x64xf32>
    %39 = vector.shape_cast %38 : vector<1x64x64xf32> to vector<64x64xf32>
    %cst_28 = arith.constant dense<0.000000e+00> : vector<16x64xf32>
    %40 = tpu.matmul %37, %39, %cst_28 {dimension_numbers = #tpu.dot_dimension_numbers<[1], [0], [0], [1], [0, 0, 1, 1], [], []>} : vector<16x64xf32>, vector<64x64xf32>, vector<16x64xf32> -> vector<16x64xf32>
    %c0_29 = arith.constant 0 : index
    %c0_30 = arith.constant 0 : index
    %c0_31 = arith.constant 0 : index
    %41 = vector.load %arg10[%c0_29, %c0_30, %c0_31] : memref<4x1x64xf32, #tpu.memory_space<vmem>>, vector<1x1x64xf32>
    %42 = vector.shape_cast %41 : vector<1x1x64xf32> to vector<1x64xf32>
    %43 = vector.broadcast %42 : vector<1x64xf32> to vector<16x64xf32>
    %44 = arith.addf %40, %43 : vector<16x64xf32>
    %cst_32 = arith.constant 0.000000e+00 : f32
    %45 = vector.broadcast %cst_32 : f32 to vector<16x64xf32>
    %46 = arith.maximumf %44, %45 : vector<16x64xf32>
    %cst_33 = arith.constant dense<0.000000e+00> : vector<8x64xf32>
    %47 = tpu.matmul %22, %46, %cst_33 {dimension_numbers = #tpu.dot_dimension_numbers<[1], [0], [0], [1], [0, 0, 1, 1], [], []>} : vector<8x16xf32>, vector<16x64xf32>, vector<8x64xf32> -> vector<8x64xf32>
    %c0_34 = arith.constant 0 : index
    %c0_35 = arith.constant 0 : index
    %c0_36 = arith.constant 0 : index
    %48 = vector.load %arg11[%c0_34, %c0_35, %c0_36] : memref<4x64x64xf32, #tpu.memory_space<vmem>>, vector<1x64x64xf32>
    %49 = vector.shape_cast %48 : vector<1x64x64xf32> to vector<64x64xf32>
    %cst_37 = arith.constant dense<0.000000e+00> : vector<8x64xf32>
    %50 = tpu.matmul %5, %49, %cst_37 {dimension_numbers = #tpu.dot_dimension_numbers<[1], [0], [0], [1], [0, 0, 1, 1], [], []>} : vector<8x64xf32>, vector<64x64xf32>, vector<8x64xf32> -> vector<8x64xf32>
    %c0_38 = arith.constant 0 : index
    %c0_39 = arith.constant 0 : index
    %c0_40 = arith.constant 0 : index
    %51 = vector.load %arg12[%c0_38, %c0_39, %c0_40] : memref<4x64x64xf32, #tpu.memory_space<vmem>>, vector<1x64x64xf32>
    %52 = vector.shape_cast %51 : vector<1x64x64xf32> to vector<64x64xf32>
    %cst_41 = arith.constant dense<0.000000e+00> : vector<8x64xf32>
    %53 = tpu.matmul %47, %52, %cst_41 {dimension_numbers = #tpu.dot_dimension_numbers<[1], [0], [0], [1], [0, 0, 1, 1], [], []>} : vector<8x64xf32>, vector<64x64xf32>, vector<8x64xf32> -> vector<8x64xf32>
    %54 = arith.addf %50, %53 : vector<8x64xf32>
    %c0_42 = arith.constant 0 : index
    %c0_43 = arith.constant 0 : index
    %c0_44 = arith.constant 0 : index
    %55 = vector.load %arg13[%c0_42, %c0_43, %c0_44] : memref<4x1x64xf32, #tpu.memory_space<vmem>>, vector<1x1x64xf32>
    %56 = vector.shape_cast %55 : vector<1x1x64xf32> to vector<1x64xf32>
    %57 = vector.broadcast %56 : vector<1x64xf32> to vector<8x64xf32>
    %58 = arith.addf %54, %57 : vector<8x64xf32>
    %cst_45 = arith.constant 0.000000e+00 : f32
    %59 = vector.broadcast %cst_45 : f32 to vector<8x64xf32>
    %60 = arith.maximumf %58, %59 : vector<8x64xf32>
    %c0_46 = arith.constant 0 : index
    %c0_47 = arith.constant 0 : index
    %c0_48 = arith.constant 0 : index
    %61 = vector.load %arg14[%c0_46, %c0_47, %c0_48] : memref<4x64x64xf32, #tpu.memory_space<vmem>>, vector<1x64x64xf32>
    %62 = vector.shape_cast %61 : vector<1x64x64xf32> to vector<64x64xf32>
    %cst_49 = arith.constant dense<0.000000e+00> : vector<8x64xf32>
    %63 = tpu.matmul %60, %62, %cst_49 {dimension_numbers = #tpu.dot_dimension_numbers<[1], [0], [0], [1], [0, 0, 1, 1], [], []>} : vector<8x64xf32>, vector<64x64xf32>, vector<8x64xf32> -> vector<8x64xf32>
    %c0_50 = arith.constant 0 : index
    %c0_51 = arith.constant 0 : index
    %c0_52 = arith.constant 0 : index
    %64 = vector.load %arg15[%c0_50, %c0_51, %c0_52] : memref<4x1x64xf32, #tpu.memory_space<vmem>>, vector<1x1x64xf32>
    %65 = vector.shape_cast %64 : vector<1x1x64xf32> to vector<1x64xf32>
    %66 = vector.broadcast %65 : vector<1x64xf32> to vector<8x64xf32>
    %67 = arith.addf %63, %66 : vector<8x64xf32>
    %cst_53 = arith.constant 0.000000e+00 : f32
    %68 = vector.broadcast %cst_53 : f32 to vector<8x64xf32>
    %69 = arith.maximumf %67, %68 : vector<8x64xf32>
    %70 = arith.addf %5, %69 : vector<8x64xf32>
    %c1 = arith.constant 1 : index
    %c0_54 = arith.constant 0 : index
    %c0_55 = arith.constant 0 : index
    %71 = vector.load %arg6[%c1, %c0_54, %c0_55] : memref<4x64x64xf32, #tpu.memory_space<vmem>>, vector<1x64x64xf32>
    %72 = vector.shape_cast %71 : vector<1x64x64xf32> to vector<64x64xf32>
    %cst_56 = arith.constant dense<0.000000e+00> : vector<8x64xf32>
    %73 = tpu.matmul %70, %72, %cst_56 {dimension_numbers = #tpu.dot_dimension_numbers<[1], [0], [0], [1], [0, 0, 1, 1], [], []>} : vector<8x64xf32>, vector<64x64xf32>, vector<8x64xf32> -> vector<8x64xf32>
    %c1_57 = arith.constant 1 : index
    %c0_58 = arith.constant 0 : index
    %c0_59 = arith.constant 0 : index
    %74 = vector.load %arg7[%c1_57, %c0_58, %c0_59] : memref<4x64x64xf32, #tpu.memory_space<vmem>>, vector<1x64x64xf32>
    %75 = vector.shape_cast %74 : vector<1x64x64xf32> to vector<64x64xf32>
    %cst_60 = arith.constant dense<0.000000e+00> : vector<8x64xf32>
    %76 = tpu.matmul %70, %75, %cst_60 {dimension_numbers = #tpu.dot_dimension_numbers<[1], [0], [0], [1], [0, 0, 1, 1], [], []>} : vector<8x64xf32>, vector<64x64xf32>, vector<8x64xf32> -> vector<8x64xf32>
    %cst_61 = arith.constant dense<0.000000e+00> : vector<16x64xf32>
    %77 = tpu.matmul %17, %73, %cst_61 {dimension_numbers = #tpu.dot_dimension_numbers<[1], [0], [0], [1], [0, 0, 1, 1], [], []>} : vector<16x8xf32>, vector<8x64xf32>, vector<16x64xf32> -> vector<16x64xf32>
    %cst_62 = arith.constant dense<0.000000e+00> : vector<16x64xf32>
    %78 = tpu.matmul %13, %76, %cst_62 {dimension_numbers = #tpu.dot_dimension_numbers<[1], [0], [0], [1], [0, 0, 1, 1], [], []>} : vector<16x8xf32>, vector<8x64xf32>, vector<16x64xf32> -> vector<16x64xf32>
    %79 = arith.addf %77, %78 : vector<16x64xf32>
    %c1_63 = arith.constant 1 : index
    %c0_64 = arith.constant 0 : index
    %c0_65 = arith.constant 0 : index
    %80 = vector.load %arg8[%c1_63, %c0_64, %c0_65] : memref<4x1x64xf32, #tpu.memory_space<vmem>>, vector<1x1x64xf32>
    %81 = vector.shape_cast %80 : vector<1x1x64xf32> to vector<1x64xf32>
    %82 = vector.broadcast %81 : vector<1x64xf32> to vector<16x64xf32>
    %83 = arith.addf %79, %82 : vector<16x64xf32>
    %cst_66 = arith.constant 0.000000e+00 : f32
    %84 = vector.broadcast %cst_66 : f32 to vector<16x64xf32>
    %85 = arith.maximumf %83, %84 : vector<16x64xf32>
    %c1_67 = arith.constant 1 : index
    %c0_68 = arith.constant 0 : index
    %c0_69 = arith.constant 0 : index
    %86 = vector.load %arg9[%c1_67, %c0_68, %c0_69] : memref<4x64x64xf32, #tpu.memory_space<vmem>>, vector<1x64x64xf32>
    %87 = vector.shape_cast %86 : vector<1x64x64xf32> to vector<64x64xf32>
    %cst_70 = arith.constant dense<0.000000e+00> : vector<16x64xf32>
    %88 = tpu.matmul %85, %87, %cst_70 {dimension_numbers = #tpu.dot_dimension_numbers<[1], [0], [0], [1], [0, 0, 1, 1], [], []>} : vector<16x64xf32>, vector<64x64xf32>, vector<16x64xf32> -> vector<16x64xf32>
    %c1_71 = arith.constant 1 : index
    %c0_72 = arith.constant 0 : index
    %c0_73 = arith.constant 0 : index
    %89 = vector.load %arg10[%c1_71, %c0_72, %c0_73] : memref<4x1x64xf32, #tpu.memory_space<vmem>>, vector<1x1x64xf32>
    %90 = vector.shape_cast %89 : vector<1x1x64xf32> to vector<1x64xf32>
    %91 = vector.broadcast %90 : vector<1x64xf32> to vector<16x64xf32>
    %92 = arith.addf %88, %91 : vector<16x64xf32>
    %cst_74 = arith.constant 0.000000e+00 : f32
    %93 = vector.broadcast %cst_74 : f32 to vector<16x64xf32>
    %94 = arith.maximumf %92, %93 : vector<16x64xf32>
    %cst_75 = arith.constant dense<0.000000e+00> : vector<8x64xf32>
    %95 = tpu.matmul %22, %94, %cst_75 {dimension_numbers = #tpu.dot_dimension_numbers<[1], [0], [0], [1], [0, 0, 1, 1], [], []>} : vector<8x16xf32>, vector<16x64xf32>, vector<8x64xf32> -> vector<8x64xf32>
    %c1_76 = arith.constant 1 : index
    %c0_77 = arith.constant 0 : index
    %c0_78 = arith.constant 0 : index
    %96 = vector.load %arg11[%c1_76, %c0_77, %c0_78] : memref<4x64x64xf32, #tpu.memory_space<vmem>>, vector<1x64x64xf32>
    %97 = vector.shape_cast %96 : vector<1x64x64xf32> to vector<64x64xf32>
    %cst_79 = arith.constant dense<0.000000e+00> : vector<8x64xf32>
    %98 = tpu.matmul %70, %97, %cst_79 {dimension_numbers = #tpu.dot_dimension_numbers<[1], [0], [0], [1], [0, 0, 1, 1], [], []>} : vector<8x64xf32>, vector<64x64xf32>, vector<8x64xf32> -> vector<8x64xf32>
    %c1_80 = arith.constant 1 : index
    %c0_81 = arith.constant 0 : index
    %c0_82 = arith.constant 0 : index
    %99 = vector.load %arg12[%c1_80, %c0_81, %c0_82] : memref<4x64x64xf32, #tpu.memory_space<vmem>>, vector<1x64x64xf32>
    %100 = vector.shape_cast %99 : vector<1x64x64xf32> to vector<64x64xf32>
    %cst_83 = arith.constant dense<0.000000e+00> : vector<8x64xf32>
    %101 = tpu.matmul %95, %100, %cst_83 {dimension_numbers = #tpu.dot_dimension_numbers<[1], [0], [0], [1], [0, 0, 1, 1], [], []>} : vector<8x64xf32>, vector<64x64xf32>, vector<8x64xf32> -> vector<8x64xf32>
    %102 = arith.addf %98, %101 : vector<8x64xf32>
    %c1_84 = arith.constant 1 : index
    %c0_85 = arith.constant 0 : index
    %c0_86 = arith.constant 0 : index
    %103 = vector.load %arg13[%c1_84, %c0_85, %c0_86] : memref<4x1x64xf32, #tpu.memory_space<vmem>>, vector<1x1x64xf32>
    %104 = vector.shape_cast %103 : vector<1x1x64xf32> to vector<1x64xf32>
    %105 = vector.broadcast %104 : vector<1x64xf32> to vector<8x64xf32>
    %106 = arith.addf %102, %105 : vector<8x64xf32>
    %cst_87 = arith.constant 0.000000e+00 : f32
    %107 = vector.broadcast %cst_87 : f32 to vector<8x64xf32>
    %108 = arith.maximumf %106, %107 : vector<8x64xf32>
    %c1_88 = arith.constant 1 : index
    %c0_89 = arith.constant 0 : index
    %c0_90 = arith.constant 0 : index
    %109 = vector.load %arg14[%c1_88, %c0_89, %c0_90] : memref<4x64x64xf32, #tpu.memory_space<vmem>>, vector<1x64x64xf32>
    %110 = vector.shape_cast %109 : vector<1x64x64xf32> to vector<64x64xf32>
    %cst_91 = arith.constant dense<0.000000e+00> : vector<8x64xf32>
    %111 = tpu.matmul %108, %110, %cst_91 {dimension_numbers = #tpu.dot_dimension_numbers<[1], [0], [0], [1], [0, 0, 1, 1], [], []>} : vector<8x64xf32>, vector<64x64xf32>, vector<8x64xf32> -> vector<8x64xf32>
    %c1_92 = arith.constant 1 : index
    %c0_93 = arith.constant 0 : index
    %c0_94 = arith.constant 0 : index
    %112 = vector.load %arg15[%c1_92, %c0_93, %c0_94] : memref<4x1x64xf32, #tpu.memory_space<vmem>>, vector<1x1x64xf32>
    %113 = vector.shape_cast %112 : vector<1x1x64xf32> to vector<1x64xf32>
    %114 = vector.broadcast %113 : vector<1x64xf32> to vector<8x64xf32>
    %115 = arith.addf %111, %114 : vector<8x64xf32>
    %cst_95 = arith.constant 0.000000e+00 : f32
    %116 = vector.broadcast %cst_95 : f32 to vector<8x64xf32>
    %117 = arith.maximumf %115, %116 : vector<8x64xf32>
    %118 = arith.addf %70, %117 : vector<8x64xf32>
    %c2 = arith.constant 2 : index
    %c0_96 = arith.constant 0 : index
    %c0_97 = arith.constant 0 : index
    %119 = vector.load %arg6[%c2, %c0_96, %c0_97] : memref<4x64x64xf32, #tpu.memory_space<vmem>>, vector<1x64x64xf32>
    %120 = vector.shape_cast %119 : vector<1x64x64xf32> to vector<64x64xf32>
    %cst_98 = arith.constant dense<0.000000e+00> : vector<8x64xf32>
    %121 = tpu.matmul %118, %120, %cst_98 {dimension_numbers = #tpu.dot_dimension_numbers<[1], [0], [0], [1], [0, 0, 1, 1], [], []>} : vector<8x64xf32>, vector<64x64xf32>, vector<8x64xf32> -> vector<8x64xf32>
    %c2_99 = arith.constant 2 : index
    %c0_100 = arith.constant 0 : index
    %c0_101 = arith.constant 0 : index
    %122 = vector.load %arg7[%c2_99, %c0_100, %c0_101] : memref<4x64x64xf32, #tpu.memory_space<vmem>>, vector<1x64x64xf32>
    %123 = vector.shape_cast %122 : vector<1x64x64xf32> to vector<64x64xf32>
    %cst_102 = arith.constant dense<0.000000e+00> : vector<8x64xf32>
    %124 = tpu.matmul %118, %123, %cst_102 {dimension_numbers = #tpu.dot_dimension_numbers<[1], [0], [0], [1], [0, 0, 1, 1], [], []>} : vector<8x64xf32>, vector<64x64xf32>, vector<8x64xf32> -> vector<8x64xf32>
    %cst_103 = arith.constant dense<0.000000e+00> : vector<16x64xf32>
    %125 = tpu.matmul %17, %121, %cst_103 {dimension_numbers = #tpu.dot_dimension_numbers<[1], [0], [0], [1], [0, 0, 1, 1], [], []>} : vector<16x8xf32>, vector<8x64xf32>, vector<16x64xf32> -> vector<16x64xf32>
    %cst_104 = arith.constant dense<0.000000e+00> : vector<16x64xf32>
    %126 = tpu.matmul %13, %124, %cst_104 {dimension_numbers = #tpu.dot_dimension_numbers<[1], [0], [0], [1], [0, 0, 1, 1], [], []>} : vector<16x8xf32>, vector<8x64xf32>, vector<16x64xf32> -> vector<16x64xf32>
    %127 = arith.addf %125, %126 : vector<16x64xf32>
    %c2_105 = arith.constant 2 : index
    %c0_106 = arith.constant 0 : index
    %c0_107 = arith.constant 0 : index
    %128 = vector.load %arg8[%c2_105, %c0_106, %c0_107] : memref<4x1x64xf32, #tpu.memory_space<vmem>>, vector<1x1x64xf32>
    %129 = vector.shape_cast %128 : vector<1x1x64xf32> to vector<1x64xf32>
    %130 = vector.broadcast %129 : vector<1x64xf32> to vector<16x64xf32>
    %131 = arith.addf %127, %130 : vector<16x64xf32>
    %cst_108 = arith.constant 0.000000e+00 : f32
    %132 = vector.broadcast %cst_108 : f32 to vector<16x64xf32>
    %133 = arith.maximumf %131, %132 : vector<16x64xf32>
    %c2_109 = arith.constant 2 : index
    %c0_110 = arith.constant 0 : index
    %c0_111 = arith.constant 0 : index
    %134 = vector.load %arg9[%c2_109, %c0_110, %c0_111] : memref<4x64x64xf32, #tpu.memory_space<vmem>>, vector<1x64x64xf32>
    %135 = vector.shape_cast %134 : vector<1x64x64xf32> to vector<64x64xf32>
    %cst_112 = arith.constant dense<0.000000e+00> : vector<16x64xf32>
    %136 = tpu.matmul %133, %135, %cst_112 {dimension_numbers = #tpu.dot_dimension_numbers<[1], [0], [0], [1], [0, 0, 1, 1], [], []>} : vector<16x64xf32>, vector<64x64xf32>, vector<16x64xf32> -> vector<16x64xf32>
    %c2_113 = arith.constant 2 : index
    %c0_114 = arith.constant 0 : index
    %c0_115 = arith.constant 0 : index
    %137 = vector.load %arg10[%c2_113, %c0_114, %c0_115] : memref<4x1x64xf32, #tpu.memory_space<vmem>>, vector<1x1x64xf32>
    %138 = vector.shape_cast %137 : vector<1x1x64xf32> to vector<1x64xf32>
    %139 = vector.broadcast %138 : vector<1x64xf32> to vector<16x64xf32>
    %140 = arith.addf %136, %139 : vector<16x64xf32>
    %cst_116 = arith.constant 0.000000e+00 : f32
    %141 = vector.broadcast %cst_116 : f32 to vector<16x64xf32>
    %142 = arith.maximumf %140, %141 : vector<16x64xf32>
    %cst_117 = arith.constant dense<0.000000e+00> : vector<8x64xf32>
    %143 = tpu.matmul %22, %142, %cst_117 {dimension_numbers = #tpu.dot_dimension_numbers<[1], [0], [0], [1], [0, 0, 1, 1], [], []>} : vector<8x16xf32>, vector<16x64xf32>, vector<8x64xf32> -> vector<8x64xf32>
    %c2_118 = arith.constant 2 : index
    %c0_119 = arith.constant 0 : index
    %c0_120 = arith.constant 0 : index
    %144 = vector.load %arg11[%c2_118, %c0_119, %c0_120] : memref<4x64x64xf32, #tpu.memory_space<vmem>>, vector<1x64x64xf32>
    %145 = vector.shape_cast %144 : vector<1x64x64xf32> to vector<64x64xf32>
    %cst_121 = arith.constant dense<0.000000e+00> : vector<8x64xf32>
    %146 = tpu.matmul %118, %145, %cst_121 {dimension_numbers = #tpu.dot_dimension_numbers<[1], [0], [0], [1], [0, 0, 1, 1], [], []>} : vector<8x64xf32>, vector<64x64xf32>, vector<8x64xf32> -> vector<8x64xf32>
    %c2_122 = arith.constant 2 : index
    %c0_123 = arith.constant 0 : index
    %c0_124 = arith.constant 0 : index
    %147 = vector.load %arg12[%c2_122, %c0_123, %c0_124] : memref<4x64x64xf32, #tpu.memory_space<vmem>>, vector<1x64x64xf32>
    %148 = vector.shape_cast %147 : vector<1x64x64xf32> to vector<64x64xf32>
    %cst_125 = arith.constant dense<0.000000e+00> : vector<8x64xf32>
    %149 = tpu.matmul %143, %148, %cst_125 {dimension_numbers = #tpu.dot_dimension_numbers<[1], [0], [0], [1], [0, 0, 1, 1], [], []>} : vector<8x64xf32>, vector<64x64xf32>, vector<8x64xf32> -> vector<8x64xf32>
    %150 = arith.addf %146, %149 : vector<8x64xf32>
    %c2_126 = arith.constant 2 : index
    %c0_127 = arith.constant 0 : index
    %c0_128 = arith.constant 0 : index
    %151 = vector.load %arg13[%c2_126, %c0_127, %c0_128] : memref<4x1x64xf32, #tpu.memory_space<vmem>>, vector<1x1x64xf32>
    %152 = vector.shape_cast %151 : vector<1x1x64xf32> to vector<1x64xf32>
    %153 = vector.broadcast %152 : vector<1x64xf32> to vector<8x64xf32>
    %154 = arith.addf %150, %153 : vector<8x64xf32>
    %cst_129 = arith.constant 0.000000e+00 : f32
    %155 = vector.broadcast %cst_129 : f32 to vector<8x64xf32>
    %156 = arith.maximumf %154, %155 : vector<8x64xf32>
    %c2_130 = arith.constant 2 : index
    %c0_131 = arith.constant 0 : index
    %c0_132 = arith.constant 0 : index
    %157 = vector.load %arg14[%c2_130, %c0_131, %c0_132] : memref<4x64x64xf32, #tpu.memory_space<vmem>>, vector<1x64x64xf32>
    %158 = vector.shape_cast %157 : vector<1x64x64xf32> to vector<64x64xf32>
    %cst_133 = arith.constant dense<0.000000e+00> : vector<8x64xf32>
    %159 = tpu.matmul %156, %158, %cst_133 {dimension_numbers = #tpu.dot_dimension_numbers<[1], [0], [0], [1], [0, 0, 1, 1], [], []>} : vector<8x64xf32>, vector<64x64xf32>, vector<8x64xf32> -> vector<8x64xf32>
    %c2_134 = arith.constant 2 : index
    %c0_135 = arith.constant 0 : index
    %c0_136 = arith.constant 0 : index
    %160 = vector.load %arg15[%c2_134, %c0_135, %c0_136] : memref<4x1x64xf32, #tpu.memory_space<vmem>>, vector<1x1x64xf32>
    %161 = vector.shape_cast %160 : vector<1x1x64xf32> to vector<1x64xf32>
    %162 = vector.broadcast %161 : vector<1x64xf32> to vector<8x64xf32>
    %163 = arith.addf %159, %162 : vector<8x64xf32>
    %cst_137 = arith.constant 0.000000e+00 : f32
    %164 = vector.broadcast %cst_137 : f32 to vector<8x64xf32>
    %165 = arith.maximumf %163, %164 : vector<8x64xf32>
    %166 = arith.addf %118, %165 : vector<8x64xf32>
    %c3 = arith.constant 3 : index
    %c0_138 = arith.constant 0 : index
    %c0_139 = arith.constant 0 : index
    %167 = vector.load %arg6[%c3, %c0_138, %c0_139] : memref<4x64x64xf32, #tpu.memory_space<vmem>>, vector<1x64x64xf32>
    %168 = vector.shape_cast %167 : vector<1x64x64xf32> to vector<64x64xf32>
    %cst_140 = arith.constant dense<0.000000e+00> : vector<8x64xf32>
    %169 = tpu.matmul %166, %168, %cst_140 {dimension_numbers = #tpu.dot_dimension_numbers<[1], [0], [0], [1], [0, 0, 1, 1], [], []>} : vector<8x64xf32>, vector<64x64xf32>, vector<8x64xf32> -> vector<8x64xf32>
    %c3_141 = arith.constant 3 : index
    %c0_142 = arith.constant 0 : index
    %c0_143 = arith.constant 0 : index
    %170 = vector.load %arg7[%c3_141, %c0_142, %c0_143] : memref<4x64x64xf32, #tpu.memory_space<vmem>>, vector<1x64x64xf32>
    %171 = vector.shape_cast %170 : vector<1x64x64xf32> to vector<64x64xf32>
    %cst_144 = arith.constant dense<0.000000e+00> : vector<8x64xf32>
    %172 = tpu.matmul %166, %171, %cst_144 {dimension_numbers = #tpu.dot_dimension_numbers<[1], [0], [0], [1], [0, 0, 1, 1], [], []>} : vector<8x64xf32>, vector<64x64xf32>, vector<8x64xf32> -> vector<8x64xf32>
    %cst_145 = arith.constant dense<0.000000e+00> : vector<16x64xf32>
    %173 = tpu.matmul %17, %169, %cst_145 {dimension_numbers = #tpu.dot_dimension_numbers<[1], [0], [0], [1], [0, 0, 1, 1], [], []>} : vector<16x8xf32>, vector<8x64xf32>, vector<16x64xf32> -> vector<16x64xf32>
    %cst_146 = arith.constant dense<0.000000e+00> : vector<16x64xf32>
    %174 = tpu.matmul %13, %172, %cst_146 {dimension_numbers = #tpu.dot_dimension_numbers<[1], [0], [0], [1], [0, 0, 1, 1], [], []>} : vector<16x8xf32>, vector<8x64xf32>, vector<16x64xf32> -> vector<16x64xf32>
    %175 = arith.addf %173, %174 : vector<16x64xf32>
    %c3_147 = arith.constant 3 : index
    %c0_148 = arith.constant 0 : index
    %c0_149 = arith.constant 0 : index
    %176 = vector.load %arg8[%c3_147, %c0_148, %c0_149] : memref<4x1x64xf32, #tpu.memory_space<vmem>>, vector<1x1x64xf32>
    %177 = vector.shape_cast %176 : vector<1x1x64xf32> to vector<1x64xf32>
    %178 = vector.broadcast %177 : vector<1x64xf32> to vector<16x64xf32>
    %179 = arith.addf %175, %178 : vector<16x64xf32>
    %cst_150 = arith.constant 0.000000e+00 : f32
    %180 = vector.broadcast %cst_150 : f32 to vector<16x64xf32>
    %181 = arith.maximumf %179, %180 : vector<16x64xf32>
    %c3_151 = arith.constant 3 : index
    %c0_152 = arith.constant 0 : index
    %c0_153 = arith.constant 0 : index
    %182 = vector.load %arg9[%c3_151, %c0_152, %c0_153] : memref<4x64x64xf32, #tpu.memory_space<vmem>>, vector<1x64x64xf32>
    %183 = vector.shape_cast %182 : vector<1x64x64xf32> to vector<64x64xf32>
    %cst_154 = arith.constant dense<0.000000e+00> : vector<16x64xf32>
    %184 = tpu.matmul %181, %183, %cst_154 {dimension_numbers = #tpu.dot_dimension_numbers<[1], [0], [0], [1], [0, 0, 1, 1], [], []>} : vector<16x64xf32>, vector<64x64xf32>, vector<16x64xf32> -> vector<16x64xf32>
    %c3_155 = arith.constant 3 : index
    %c0_156 = arith.constant 0 : index
    %c0_157 = arith.constant 0 : index
    %185 = vector.load %arg10[%c3_155, %c0_156, %c0_157] : memref<4x1x64xf32, #tpu.memory_space<vmem>>, vector<1x1x64xf32>
    %186 = vector.shape_cast %185 : vector<1x1x64xf32> to vector<1x64xf32>
    %187 = vector.broadcast %186 : vector<1x64xf32> to vector<16x64xf32>
    %188 = arith.addf %184, %187 : vector<16x64xf32>
    %cst_158 = arith.constant 0.000000e+00 : f32
    %189 = vector.broadcast %cst_158 : f32 to vector<16x64xf32>
    %190 = arith.maximumf %188, %189 : vector<16x64xf32>
    %cst_159 = arith.constant dense<0.000000e+00> : vector<8x64xf32>
    %191 = tpu.matmul %22, %190, %cst_159 {dimension_numbers = #tpu.dot_dimension_numbers<[1], [0], [0], [1], [0, 0, 1, 1], [], []>} : vector<8x16xf32>, vector<16x64xf32>, vector<8x64xf32> -> vector<8x64xf32>
    %c3_160 = arith.constant 3 : index
    %c0_161 = arith.constant 0 : index
    %c0_162 = arith.constant 0 : index
    %192 = vector.load %arg11[%c3_160, %c0_161, %c0_162] : memref<4x64x64xf32, #tpu.memory_space<vmem>>, vector<1x64x64xf32>
    %193 = vector.shape_cast %192 : vector<1x64x64xf32> to vector<64x64xf32>
    %cst_163 = arith.constant dense<0.000000e+00> : vector<8x64xf32>
    %194 = tpu.matmul %166, %193, %cst_163 {dimension_numbers = #tpu.dot_dimension_numbers<[1], [0], [0], [1], [0, 0, 1, 1], [], []>} : vector<8x64xf32>, vector<64x64xf32>, vector<8x64xf32> -> vector<8x64xf32>
    %c3_164 = arith.constant 3 : index
    %c0_165 = arith.constant 0 : index
    %c0_166 = arith.constant 0 : index
    %195 = vector.load %arg12[%c3_164, %c0_165, %c0_166] : memref<4x64x64xf32, #tpu.memory_space<vmem>>, vector<1x64x64xf32>
    %196 = vector.shape_cast %195 : vector<1x64x64xf32> to vector<64x64xf32>
    %cst_167 = arith.constant dense<0.000000e+00> : vector<8x64xf32>
    %197 = tpu.matmul %191, %196, %cst_167 {dimension_numbers = #tpu.dot_dimension_numbers<[1], [0], [0], [1], [0, 0, 1, 1], [], []>} : vector<8x64xf32>, vector<64x64xf32>, vector<8x64xf32> -> vector<8x64xf32>
    %198 = arith.addf %194, %197 : vector<8x64xf32>
    %c3_168 = arith.constant 3 : index
    %c0_169 = arith.constant 0 : index
    %c0_170 = arith.constant 0 : index
    %199 = vector.load %arg13[%c3_168, %c0_169, %c0_170] : memref<4x1x64xf32, #tpu.memory_space<vmem>>, vector<1x1x64xf32>
    %200 = vector.shape_cast %199 : vector<1x1x64xf32> to vector<1x64xf32>
    %201 = vector.broadcast %200 : vector<1x64xf32> to vector<8x64xf32>
    %202 = arith.addf %198, %201 : vector<8x64xf32>
    %cst_171 = arith.constant 0.000000e+00 : f32
    %203 = vector.broadcast %cst_171 : f32 to vector<8x64xf32>
    %204 = arith.maximumf %202, %203 : vector<8x64xf32>
    %c3_172 = arith.constant 3 : index
    %c0_173 = arith.constant 0 : index
    %c0_174 = arith.constant 0 : index
    %205 = vector.load %arg14[%c3_172, %c0_173, %c0_174] : memref<4x64x64xf32, #tpu.memory_space<vmem>>, vector<1x64x64xf32>
    %206 = vector.shape_cast %205 : vector<1x64x64xf32> to vector<64x64xf32>
    %cst_175 = arith.constant dense<0.000000e+00> : vector<8x64xf32>
    %207 = tpu.matmul %204, %206, %cst_175 {dimension_numbers = #tpu.dot_dimension_numbers<[1], [0], [0], [1], [0, 0, 1, 1], [], []>} : vector<8x64xf32>, vector<64x64xf32>, vector<8x64xf32> -> vector<8x64xf32>
    %c3_176 = arith.constant 3 : index
    %c0_177 = arith.constant 0 : index
    %c0_178 = arith.constant 0 : index
    %208 = vector.load %arg15[%c3_176, %c0_177, %c0_178] : memref<4x1x64xf32, #tpu.memory_space<vmem>>, vector<1x1x64xf32>
    %209 = vector.shape_cast %208 : vector<1x1x64xf32> to vector<1x64xf32>
    %210 = vector.broadcast %209 : vector<1x64xf32> to vector<8x64xf32>
    %211 = arith.addf %207, %210 : vector<8x64xf32>
    %cst_179 = arith.constant 0.000000e+00 : f32
    %212 = vector.broadcast %cst_179 : f32 to vector<8x64xf32>
    %213 = arith.maximumf %211, %212 : vector<8x64xf32>
    %214 = arith.addf %166, %213 : vector<8x64xf32>
    %cst_180 = arith.constant dense<0.000000e+00> : vector<64xf32>
    %215 = vector.multi_reduction <add>, %214, %cst_180 [0] : vector<8x64xf32> to vector<64xf32>
    %216 = vector.shape_cast %215 : vector<64xf32> to vector<1x64xf32>
    %cst_181 = arith.constant 1.250000e-01 : f32
    %217 = vector.broadcast %cst_181 : f32 to vector<1x64xf32>
    %218 = arith.mulf %216, %217 : vector<1x64xf32>
    %c0_182 = arith.constant 0 : index
    %c0_183 = arith.constant 0 : index
    %219 = vector.load %arg16[%c0_182, %c0_183] : memref<64x1xf32, #tpu.memory_space<vmem>>, vector<64x1xf32>
    %cst_184 = arith.constant dense<0.000000e+00> : vector<1x1xf32>
    %220 = tpu.matmul %218, %219, %cst_184 {dimension_numbers = #tpu.dot_dimension_numbers<[1], [0], [0], [1], [0, 0, 1, 1], [], []>} : vector<1x64xf32>, vector<64x1xf32>, vector<1x1xf32> -> vector<1x1xf32>
    %c0_185 = arith.constant 0 : index
    %c0_186 = arith.constant 0 : index
    %221 = vector.load %arg17[%c0_185, %c0_186] : memref<1x1xf32, #tpu.memory_space<vmem>>, vector<1x1xf32>
    %222 = arith.addf %220, %221 : vector<1x1xf32>
    %c0_187 = arith.constant 0 : index
    %c0_188 = arith.constant 0 : index
    %223 = vector.load %arg18[%c0_187, %c0_188] : memref<1x1xf32, #tpu.memory_space<vmem>>, vector<1x1xf32>
    tpu.vector_store %arg18[%c0_187, %c0_188], %222 {strides = array<i32>} : memref<1x1xf32, #tpu.memory_space<vmem>>, vector<1x1xf32>,
    return
  }
}

</mosaic_0001>

<bundles_post_ra>
// kernel: value_network_forward.1
= control target key start
LH: loop header
LB: loop body
LE: loop exit
PB: predicated region body
PF: predicated region fallthrough
CT: control target
= control target key end

     0   :  { %s5411_s0 = inlined_call_operand.vmem [shape: s32[16,1], index: 0, kind: input, shape index: {}]   ;;  %s5412_s1 = inlined_call_operand.vmem [shape: s32[16,1], index: 1, kind: input, shape index: {}]   ;;  %s5413_s2 = inlined_call_operand.vmem [shape: s32[1,16], index: 2, kind: input, shape index: {}]   ;;  %s5414_s3 = inlined_call_operand.vmem [shape: f32[8,7], index: 3, kind: input, shape index: {}]   ;;  %s5415_s4 = inlined_call_operand.vmem [shape: f32[7,64], index: 4, kind: input, shape index: {}]   ;;  %s5416_s5 = inlined_call_operand.vmem [shape: f32[1,64], index: 5, kind: input, shape index: {}]   ;;  %s5417_s6 = inlined_call_operand.hbm [shape: f32[4,64,64], index: 6, kind: input, shape index: {}]   ;;  %s5418_s7 = inlined_call_operand.hbm [shape: f32[4,64,64], index: 7, kind: input, shape index: {}]   ;;  %s5419_s8 = inlined_call_operand.vmem [shape: f32[4,1,64], index: 8, kind: input, shape index: {}]   ;;  %s5420_s9 = inlined_call_operand.hbm [shape: f32[4,64,64], index: 9, kind: input, shape index: {}]   ;;  %s5421_s10 = inlined_call_operand.vmem [shape: f32[4,1,64], index: 10, kind: input, shape index: {}]   ;;  %s5422_s11 = inlined_call_operand.hbm [shape: f32[4,64,64], index: 11, kind: input, shape index: {}]   ;;  %s5423_s12 = inlined_call_operand.hbm [shape: f32[4,64,64], index: 12, kind: input, shape index: {}]   ;;  %s5424_s13 = inlined_call_operand.vmem [shape: f32[4,1,64], index: 13, kind: input, shape index: {}]   ;;  %s5425_s14 = inlined_call_operand.hbm [shape: f32[4,64,64], index: 14, kind: input, shape index: {}]   ;;  %s5426_s15 = inlined_call_operand.vmem [shape: f32[4,1,64], index: 15, kind: input, shape index: {}]   ;;  %s5427_s16 = inlined_call_operand.vmem [shape: f32[64,1], index: 16, kind: input, shape index: {}]   ;;  %s5428_s17 = inlined_call_operand.<no memory space> [shape: f32[1,1], index: 17, kind: input, shape index: {}]   ;;  %s5429_s18 = inlined_call_operand.hbm [shape: f32[1,1], index: 18, kind: output, shape index: {}]  }
   0x1   :  { %5432 = sst [smem:[#allocation20_spill]] %s5411_s0  ;;  %v23_v0 = vstv %s5428_s17 }
   0x2   :  { %5433 = sst [smem:[#allocation21_spill]] %s5412_s1  ;;  %24 = vst [vmem:[#allocation2] sm:$0x1] %v23_v0 }
   0x3   :  { %5434 = sst [smem:[#allocation22_spill]] %s5413_s2 }
   0x4   :  { %25 = vsyncpa [#allocation4], 0 }
   0x5   :  { %26 = vsyncpa [#allocation7], 0 }
   0x6   :  { %27 = vsyncpa [#allocation10], 0 }
   0x7   :  { %28 = vsyncpa [#allocation13], 0 }
   0x8   :  { %29 = vsyncpa [#allocation5], 0  ;;  %s4829_s29 = smov [#allocation6]   ;;  %s4830_s0 = smov [#allocation9]  }
   0x9   :  { %s59_s30 = sshll.u32 %s4829_s29, 4  ;;  %s87_s19 = sshll.u32 %s4830_s0, 4  ;;  %s60_s30 = int_to_ptr.vmem [resolvable:$true] %s59_s30  ;;  %s4940_s19 = int_to_ptr.vmem [resolvable:$true] %s87_s19 }
   0xa   :  { %s4665_s21 = scalar_lea.hbm %s5418_s7, 4096 }
   0xb   :  { %p4666_p0 = scmp.ne.s32.totalorder %s5418_s7, %s4665_s21  ;;  %p4669_p1 = scmp.lt.u32.totalorder %s4665_s21, %s5418_s7 }
   0xd   :  { %p4671_p2 = pnand %p4669_p1, %p4666_p0 }
   0xf   :  { %4674 = shalt.err (!%p4671_p2)
}
  0x10   :  { %s4675_s24 = scalar_lea.vmem %s60_s30, 4096  ;;  %p4680_p4 = scmp.lt.s32.totalorder %s60_s30, %s60_s30 }
  0x11   :  { %p4676_p3 = scmp.ne.s32.totalorder %s60_s30, %s4675_s24  ;;  %p4681_p5 = scmp.lt.s32.totalorder %s4675_s24, %s4675_s24 }
  0x13   :  { %p4682_p6 = por %p4681_p5, %p4680_p4 }
  0x15   :  { %p4683_p7 = pnand %p4682_p6, %p4676_p3 }
  0x17   :  { %4686 = shalt.err (!%p4683_p7)
}
  0x18   :  { %s4831_s25 = smov 128   ;;  %s4832_s26 = smov 8  }
  0x19   :  { %65 = dma.hbm_to_vmem [thread:$0]  %s5418_s7, 4096, %s60_s30, [#allocation7], %s4831_s25, %s4831_s25, %s4832_s26  }
  0x1a   :  { %s4687_s1 = scalar_lea.hbm %s5422_s11, 4096 }
  0x1b   :  { %p4688_p8 = scmp.ne.s32.totalorder %s5422_s11, %s4687_s1  ;;  %p4691_p9 = scmp.lt.u32.totalorder %s4687_s1, %s5422_s11 }
  0x1d   :  { %p4693_p10 = pnand %p4691_p9, %p4688_p8 }
  0x1f   :  { %4696 = shalt.err (!%p4693_p10)
}
  0x20   :  { %s4697_s17 = scalar_lea.vmem %s4940_s19, 4096  ;;  %p4702_p12 = scmp.lt.s32.totalorder %s4940_s19, %s4940_s19 }
  0x21   :  { %p4698_p11 = scmp.ne.s32.totalorder %s4940_s19, %s4697_s17  ;;  %p4703_p13 = scmp.lt.s32.totalorder %s4697_s17, %s4697_s17 }
  0x23   :  { %p4704_p0 = por %p4703_p13, %p4702_p12 }
  0x25   :  { %p4705_p1 = pnand %p4704_p0, %p4698_p11 }
  0x27   :  { %4708 = shalt.err (!%p4705_p1)
}
  0x28   :  { %93 = dma.hbm_to_vmem [thread:$0]  %s5422_s11, 4096, %s4940_s19, [#allocation10], %s4831_s25, %s4831_s25, %s4832_s26  }
  0x29   :  { %s4833_s23 = smov [#allocation3]   ;;  %s4834_s27 = smov [#allocation8]  }
  0x2a   :  { %s47_s24 = sshll.u32 %s4833_s23, 4  ;;  %s73_s28 = sshll.u32 %s4834_s27, 4  ;;  %s48_s24 = int_to_ptr.vmem [resolvable:$true] %s47_s24  ;;  %s4977_s28 = int_to_ptr.vmem [resolvable:$true] %s73_s28 }
  0x2b   :  { %s4709_s1 = scalar_lea.hbm %s5417_s6, 4096 }
  0x2c   :  { %p4710_p2 = scmp.ne.s32.totalorder %s5417_s6, %s4709_s1  ;;  %p4713_p3 = scmp.lt.u32.totalorder %s4709_s1, %s5417_s6 }
  0x2e   :  { %p4715_p4 = pnand %p4713_p3, %p4710_p2 }
  0x30   :  { %4718 = shalt.err (!%p4715_p4)
}
  0x31   :  { %s4719_s11 = scalar_lea.vmem %s48_s24, 4096  ;;  %p4724_p6 = scmp.lt.s32.totalorder %s48_s24, %s48_s24 }
  0x32   :  { %p4720_p5 = scmp.ne.s32.totalorder %s48_s24, %s4719_s11  ;;  %p4725_p7 = scmp.lt.s32.totalorder %s4719_s11, %s4719_s11 }
  0x34   :  { %p4726_p8 = por %p4725_p7, %p4724_p6 }
  0x36   :  { %p4727_p9 = pnand %p4726_p8, %p4720_p5 }
  0x38   :  { %4730 = shalt.err (!%p4727_p9)
}
  0x39   :  { %53 = dma.hbm_to_vmem [thread:$0]  %s5417_s6, 4096, %s48_s24, [#allocation4], %s4831_s25, %s4831_s25, %s4832_s26  }
  0x3a   :  { %s4731_s23 = scalar_lea.hbm %s5420_s9, 4096 }
  0x3b   :  { %p4732_p10 = scmp.ne.s32.totalorder %s5420_s9, %s4731_s23  ;;  %p4735_p11 = scmp.lt.u32.totalorder %s4731_s23, %s5420_s9 }
  0x3d   :  { %p4737_p12 = pnand %p4735_p11, %p4732_p10 }
  0x3f   :  { %4740 = shalt.err (!%p4737_p12)
}
  0x40   :  { %s4741_s20 = scalar_lea.vmem %s4977_s28, 4096  ;;  %p4746_p0 = scmp.lt.s32.totalorder %s4977_s28, %s4977_s28 }
  0x41   :  { %p4742_p13 = scmp.ne.s32.totalorder %s4977_s28, %s4741_s20  ;;  %p4747_p1 = scmp.lt.s32.totalorder %s4741_s20, %s4741_s20 }
  0x43   :  { %p4748_p2 = por %p4747_p1, %p4746_p0 }
  0x45   :  { %p4749_p3 = pnand %p4748_p2, %p4742_p13 }
  0x47   :  { %4752 = shalt.err (!%p4749_p3)
}
  0x48   :  { %79 = dma.hbm_to_vmem [thread:$0]  %s5420_s9, 4096, %s4977_s28, [#allocation7], %s4831_s25, %s4831_s25, %s4832_s26  }
  0x49   :  { %s4835_s21 = smov [#allocation11]   ;;  %s4836_s2 = smov [#allocation12]  }
  0x4a   :  { %s99_s22 = sshll.u32 %s4835_s21, 4  ;;  %s113_s11 = sshll.u32 %s4836_s2, 4  ;;  %s100_s22 = int_to_ptr.vmem [resolvable:$true] %s99_s22  ;;  %s5014_s11 = int_to_ptr.vmem [resolvable:$true] %s113_s11 }
  0x4b   :  { %s4753_s7 = scalar_lea.hbm %s5423_s12, 4096 }
  0x4c   :  { %p4754_p4 = scmp.ne.s32.totalorder %s5423_s12, %s4753_s7  ;;  %p4757_p5 = scmp.lt.u32.totalorder %s4753_s7, %s5423_s12 }
  0x4e   :  { %p4759_p6 = pnand %p4757_p5, %p4754_p4 }
  0x50   :  { %4762 = shalt.err (!%p4759_p6)
}
  0x51   :  { %s4763_s9 = scalar_lea.vmem %s100_s22, 4096  ;;  %p4768_p8 = scmp.lt.s32.totalorder %s100_s22, %s100_s22 }
  0x52   :  { %p4764_p7 = scmp.ne.s32.totalorder %s100_s22, %s4763_s9  ;;  %p4769_p9 = scmp.lt.s32.totalorder %s4763_s9, %s4763_s9 }
  0x54   :  { %p4770_p10 = por %p4769_p9, %p4768_p8 }
  0x56   :  { %p4771_p11 = pnand %p4770_p10, %p4764_p7 }
  0x58   :  { %4774 = shalt.err (!%p4771_p11)
}
  0x59   :  { %105 = dma.hbm_to_vmem [thread:$0]  %s5423_s12, 4096, %s100_s22, [#allocation10], %s4831_s25, %s4831_s25, %s4832_s26  }
  0x5a   :  { %s4775_s6 = scalar_lea.hbm %s5425_s14, 4096 }
  0x5b   :  { %p4776_p12 = scmp.ne.s32.totalorder %s5425_s14, %s4775_s6  ;;  %p4779_p13 = scmp.lt.u32.totalorder %s4775_s6, %s5425_s14 }
  0x5d   :  { %p4781_p0 = pnand %p4779_p13, %p4776_p12 }
  0x5f   :  { %4784 = shalt.err (!%p4781_p0)
}
  0x60   :  { %s4785_s17 = scalar_lea.vmem %s5014_s11, 4096  ;;  %p4790_p2 = scmp.lt.s32.totalorder %s5014_s11, %s5014_s11 }
  0x61   :  { %p4786_p1 = scmp.ne.s32.totalorder %s5014_s11, %s4785_s17  ;;  %p4791_p3 = scmp.lt.s32.totalorder %s4785_s17, %s4785_s17 }
  0x63   :  { %p4792_p4 = por %p4791_p3, %p4790_p2 }
  0x65   :  { %p4793_p5 = pnand %p4792_p4, %p4786_p1 }
  0x67   :  { %4796 = shalt.err (!%p4793_p5)
}
  0x68   :  { %119 = dma.hbm_to_vmem [thread:$0]  %s5425_s14, 4096, %s5014_s11, [#allocation13], %s4831_s25, %s4831_s25, %s4832_s26  }
  0x69   :  { %4819 = dma.done.wait [#allocation4], 4096  }
  0x6a   :  { %4820 = vsyncadd [#allocation4], 4294963200 }
  0x6b   :  { %4821 = dma.done.wait [#allocation7], 8192  }
  0x6c   :  { %4822 = vsyncadd [#allocation7], 4294959104 }
  0x6d   :  { %4823 = dma.done.wait [#allocation10], 8192  }
  0x6e   :  { %4824 = vsyncadd [#allocation10], 4294959104 }
  0x6f   :  { %4825 = dma.done.wait [#allocation13], 4096  }
  0x70   :  { %4826 = vsyncadd [#allocation13], 4294963200  ;;  %v4837_v1 = vmov 0.0   ;;  %vm4838_vm0 = vmmov 0   ;;  %v4839_v2 = vmov 0.0|0.0   ;;  %vm157_vm1 = vcmask 1046528  }
  0x71   :  { %3766 = vmatprep.subr.mxu0 %v4837_v1  ;;  %3768 = vmatprep.mubr.msk.f32.mxu0 %vm4838_vm0, %v4837_v1  ;;  %vm153_vm2 = vcmask 56320   ;;  %v145_v3 = vld [vmem:[%s5415_s4] sm:$0x7f]  ;;  %v272_v6 = vld [vmem:[#allocation3 + $0x8] sm:$0xff]  ;;  %v273_v11 = vld [vmem:[#allocation3 + $0x10] sm:$0xff]  ;;  %s5435_s7 = sld [smem:[#allocation20_spill]]  ;;  %v236_v34 = vlaneseq }
  0x72   :  { %4314 = vmatprep.subr.bf16.mxu1 %v4839_v2  ;;  %3787 = vmatprep.mubr.msk.f32.mxu1 %vm4838_vm0, %v4837_v1  ;;  %v144_v4 = vld [vmem:[%s5414_s3] sm:$0xff]  ;;  %v354_v8 = vld [vmem:[#allocation6 + $0x8] sm:$0xff]  ;;  %v355_v13 = vld [vmem:[#allocation6 + $0x10] sm:$0xff]  ;;  %s5436_s27 = sld [smem:[#allocation21_spill]]  ;;  %v4840_v31 = vmov 0   ;;  %vm279_vm3 = vcmask 523264  }
  0x73   :  { %v271_v5 = vld [vmem:[#allocation3] sm:$0xff]  ;;  %3767 = vmatpush3.msk.msra.mxu0 %vm157_vm1, %v145_v3  ;;  %v274_v12 = vld [vmem:[#allocation3 + $0x18] sm:$0xff]  ;;  %v276_v18 = vld [vmem:[#allocation3 + $0x28] sm:$0xff]  ;;  %4663 = vset.pattern.permute.xlu0 %v4840_v31  ;;  %v237_v39 = vand.u32 127, %v236_v34  ;;  %vm431_vm4 = vcmask 64512   ;;  %s5437_s17 = sld [smem:[#allocation22_spill]] }
  0x74   :  { %v353_v7 = vld [vmem:[#allocation6] sm:$0xff]  ;;  %3769 = vmatmul.mubr.msk.f32.vlgmr.msra.gmra.mrb[0].mxu0 %vm153_vm2, %v144_v4  ;;  %4326 = vmatprep.subr.bf16.mxu0 %v4839_v2  ;;  %v4315_v9 = vpack.c.bf16 %v272_v6, %v271_v5  ;;  %v356_v14 = vld [vmem:[#allocation6 + $0x18] sm:$0xff]  ;;  %v4318_v15 = vpack.c.bf16 %v274_v12, %v273_v11  ;;  %v358_v20 = vld [vmem:[#allocation6 + $0x28] sm:$0xff]  ;;  %vm703_vm10 = vcmask 130048   ;;  %vm3393_vm11 = vcmask 0  }
  0x75   :  { %v4327_v10 = vpack.c.bf16 %v354_v8, %v353_v7  ;;  %3806 = vmatprep.mubr.msk.f32.mxu0 %vm4838_vm0, %v4837_v1  ;;  %v4330_v16 = vpack.c.bf16 %v356_v14, %v355_v13  ;;  %v275_v17 = vld [vmem:[#allocation3 + $0x20] sm:$0xff]  ;;  %v277_v23 = vld [vmem:[#allocation3 + $0x30] sm:$0xff]  ;;  %v278_v24 = vld [vmem:[#allocation3 + $0x38] sm:$0xff]  ;;  %4664 = vset.pattern.permute.xlu1 %v4840_v31 }
  0x76   :  { %4316 = vmatpush3.bf16.msra.mxu1 %v4315_v9  ;;  %v357_v19 = vld [vmem:[#allocation6 + $0x20] sm:$0xff]  ;;  %v4321_v21 = vpack.c.bf16 %v276_v18, %v275_v17  ;;  %v359_v25 = vld [vmem:[#allocation6 + $0x30] sm:$0xff]  ;;  %v4324_v26 = vpack.c.bf16 %v278_v24, %v277_v23  ;;  %v360_v27 = vld [vmem:[#allocation6 + $0x38] sm:$0xff] }
  0x77   :  { %4328 = vmatpush3.bf16.msra.mxu0 %v4327_v10  ;;  %4317 = vmatprep.subr.bf16.mxu1 %v4839_v2  ;;  %v4333_v22 = vpack.c.bf16 %v358_v20, %v357_v19  ;;  %v4336_v28 = vpack.c.bf16 %v360_v27, %v359_v25  ;;  %v231_v29 = vld [vmem:[%s5435_s7] sm:$0xff]  ;;  %v232_v32 = vld [vmem:[%s5435_s7 + $0x8] sm:$0xff]  ;;  %v607_v44 = vld [vmem:[#allocation8 + $0x10] sm:$0xff]  ;;  %v263_v25 = vshrl.u32 %v236_v34, 7 }
  0x78   :  { %4329 = vmatprep.subr.bf16.mxu0 %v4839_v2  ;;  %v233_v30 = vld [vmem:[%s5436_s27] sm:$0xff]  ;;  %239 = vperm.xlu0 %4663, %v231_v29   ;;  %v234_v33 = vld [vmem:[%s5436_s27 + $0x8] sm:$0xff]  ;;  %v611_v61 = vld [vmem:[#allocation8 + $0x30] sm:$0xff] }
  0x79   :  { %251 = vperm.xlu1 %4664, %v233_v30   ;;  %v3413_v35 = vld [vmem:[%s5416_s5] ss:$0 sm:$0xff]  ;;  %v605_v42 = vld [vmem:[#allocation8] sm:$0xff]  ;;  %v606_v43 = vld [vmem:[#allocation8 + $0x8] sm:$0xff] }
  0x7a   :  { %4319 = vmatpush3.bf16.msra.mxu1 %v4318_v15  ;;  %v4338_v45 = vpack.c.bf16 %v606_v43, %v605_v42  ;;  %v608_v46 = vld [vmem:[#allocation8 + $0x18] sm:$0xff]  ;;  %v609_v48 = vld [vmem:[#allocation8 + $0x20] sm:$0xff]  ;;  %v610_v49 = vld [vmem:[#allocation8 + $0x28] sm:$0xff] }
  0x7b   :  { %4331 = vmatpush3.bf16.msra.mxu0 %v4330_v16  ;;  %4320 = vmatprep.subr.bf16.mxu1 %v4839_v2  ;;  %v4342_v47 = vpack.c.bf16 %v608_v46, %v607_v44  ;;  %v4346_v50 = vpack.c.bf16 %v610_v49, %v609_v48  ;;  %v612_v62 = vld [vmem:[#allocation8 + $0x38] sm:$0xff]  ;;  %v777_v6 = vld [vmem:[#allocation9] sm:$0xff]  ;;  %v778_v7 = vld [vmem:[#allocation9 + $0x8] sm:$0xff] }
  0x7c   :  { %4332 = vmatprep.subr.bf16.mxu0 %v4839_v2  ;;  %242 = vperm.xlu0 %4663, %v232_v32   ;;  %v4350_v63 = vpack.c.bf16 %v612_v62, %v611_v61  ;;  %v3428_v0 = vld [vmem:[%s5419_s8] ss:$0 sm:$0xff]  ;;  %v4370_v10 = vpack.c.bf16 %v778_v7, %v777_v6  ;;  %v779_v12 = vld [vmem:[#allocation9 + $0x10] sm:$0xff]  ;;  %v781_v15 = vld [vmem:[#allocation9 + $0x20] sm:$0xff] }
  0x7d   :  { %254 = vperm.xlu1 %4664, %v234_v33   ;;  %v780_v13 = vld [vmem:[#allocation9 + $0x18] sm:$0xff]  ;;  %v782_v16 = vld [vmem:[#allocation9 + $0x28] sm:$0xff]  ;;  %v783_v18 = vld [vmem:[#allocation9 + $0x30] sm:$0xff] }
  0x7e   :  { %4322 = vmatpush3.bf16.msra.mxu1 %v4321_v21  ;;  %v4373_v14 = vpack.c.bf16 %v780_v13, %v779_v12  ;;  %v4376_v17 = vpack.c.bf16 %v782_v16, %v781_v15  ;;  %v784_v19 = vld [vmem:[#allocation9 + $0x38] sm:$0xff]  ;;  %v785_v30 = vld [vmem:[#allocation11] sm:$0xff]  ;;  %v786_v31 = vld [vmem:[#allocation11 + $0x8] sm:$0xff] }
  0x7f   :  { %4334 = vmatpush3.bf16.msra.mxu0 %v4333_v22  ;;  %4323 = vmatprep.subr.bf16.mxu1 %v4839_v2  ;;  %v4379_v20 = vpack.c.bf16 %v784_v19, %v783_v18  ;;  %v3429_v21 = vld [vmem:[%s5421_s10] ss:$0 sm:$0xff]  ;;  %v787_v34 = vld [vmem:[#allocation11 + $0x10] sm:$0xff]  ;;  %v945_v48 = vld [vmem:[#allocation12] sm:$0xff] }
  0x80   :  { %4335 = vmatprep.subr.bf16.mxu0 %v4839_v2  ;;  %v3420_v27 = vld [vmem:[%s5437_s17] ss:$0 sm:$0xff]  ;;  %v946_v49 = vld [vmem:[#allocation12 + $0x8] sm:$0xff]  ;;  %v951_v62 = vld [vmem:[#allocation12 + $0x30] sm:$0xff] }
  0x81   :  { %vm268_vm9 = vcmp.eq.s32.totalorder %v263_v25, %v3420_v27  ;;  %v792_v46 = vld [vmem:[#allocation11 + $0x38] sm:$0xff]  ;;  %v1038_v6 = vld [vmem:[#allocation3 + $0x50] sm:$0xff]  ;;  %v1118_v13 = vld [vmem:[#allocation6 + $0x40] sm:$0xff] }
  0x82   :  { %4325 = vmatpush3.bf16.msra.mxu1 %v4324_v26  ;;  %v5141_v33 = vsel %vm268_vm9, 1.0, %v4837_v1  ;;  %v1039_v7 = vld [vmem:[#allocation3 + $0x58] sm:$0xff]  ;;  %v1120_v18 = vld [vmem:[#allocation6 + $0x50] sm:$0xff]  ;;  %v1123_v25 = vld [vmem:[#allocation6 + $0x68] sm:$0xff] }
  0x83   :  { %4337 = vmatpush3.bf16.msra.mxu0 %v4336_v28  ;;  %v1121_v19 = vld [vmem:[#allocation6 + $0x58] sm:$0xff]  ;;  %v1042_v27 = vld [vmem:[#allocation3 + $0x70] sm:$0xff] }
  0x84   :  { %4339 = vmatprep.subr.bf16.mxu0 %v4338_v45 }
  0xf7   :  { %v240_v40 = vpop.permute.xlu0 %239 }
  0xf8   :  { %vm244_vm5 = vcmp.eq.s32.totalorder %v237_v39, %v240_v40  ;;  %v252_v52 = vpop.permute.xlu1 %251  ;;  %v790_v40 = vld [vmem:[#allocation11 + $0x28] sm:$0xff] }
  0xf9   :  { %v5095_v41 = vsel %vm244_vm5, 1.0, %v4837_v1  ;;  %vm256_vm6 = vcmp.eq.s32.totalorder %v237_v39, %v252_v52  ;;  %v948_v52 = vld [vmem:[#allocation12 + $0x18] sm:$0xff] }
  0xfa   :  { %v5100_v55 = vsel %vm256_vm6, 1.0, %v4837_v1 }
  0xfb   :  { %v243_v51 = vpop.permute.xlu0 %242 }
  0xfc   :  { %vm245_vm7 = vcmp.eq.s32.totalorder %v237_v39, %v243_v51  ;;  %v255_v59 = vpop.permute.xlu1 %254  ;;  %v947_v51 = vld [vmem:[#allocation12 + $0x10] sm:$0xff] }
  0xfd   :  { %v5103_v58 = vsel %vm245_vm7, 1.0, %v4837_v1  ;;  %vm257_vm8 = vcmp.eq.s32.totalorder %v237_v39, %v255_v59  ;;  %v789_v39 = vld [vmem:[#allocation11 + $0x20] sm:$0xff]  ;;  %v950_v59 = vld [vmem:[#allocation12 + $0x28] sm:$0xff] }
  0xfe   :  { %v5111_v60 = vsel %vm257_vm8, 1.0, %v4837_v1  ;;  %v4364_v43 = vpack.c.bf16 %v790_v40, %v789_v39 }
 0x147   :  { %v227_v36 = vpop.f32.mrb[0].mxu0 }
 0x148   :  { %v5087_v37 = vadd.f32 %v3413_v35, %v227_v36  ;;  %v3770_v38 = vpop.f32.mrb[1].mxu0  ;;  %v4358_v35 = vpack.c.bf16 %v786_v31, %v785_v30  ;;  %v788_v36 = vld [vmem:[#allocation11 + $0x18] sm:$0xff] }
 0x149   :  { %v4361_v38 = vpack.c.bf16 %v788_v36, %v787_v34  ;;  %v1125_v31 = vld [vmem:[#allocation6 + $0x78] sm:$0xff] }
 0x14a   :  { %3788 = vmatmul.mubr.msk.f32.vlgmr.msra.gmra.mrb[0].mxu1 %vm279_vm3, %v5087_v37  ;;  %3807 = vmatmul.mubr.msk.f32.vlgmr.msra.gmra.mrb[2].mxu0 %vm279_vm3, %v5087_v37 }
 0x14b   :  { %3811 = vmatprep.mubr.msk.f32.mxu1 %vm431_vm4, %v5095_v41  ;;  %4341 = vmatpush3.bf16.msra.mxu0 %v4338_v45  ;;  %v791_v45 = vld [vmem:[#allocation11 + $0x30] sm:$0xff] }
 0x14c   :  { %4343 = vmatprep.subr.bf16.mxu0 %v4342_v47 }
 0x14f   :  { %4345 = vmatpush3.bf16.msra.mxu0 %v4342_v47  ;;  %v4367_v47 = vpack.c.bf16 %v792_v46, %v791_v45  ;;  %v1362_v45 = vld [vmem:[#allocation8 + $0x58] sm:$0xff] }
 0x150   :  { %4347 = vmatprep.subr.bf16.mxu0 %v4346_v50 }
 0x153   :  { %4349 = vmatpush3.bf16.msra.mxu0 %v4346_v50  ;;  %v4382_v50 = vpack.c.bf16 %v946_v49, %v945_v48 }
 0x154   :  { %4351 = vmatprep.subr.bf16.mxu0 %v4350_v63 }
 0x157   :  { %4353 = vmatpush3.bf16.msra.mxu0 %v4350_v63  ;;  %v952_v63 = vld [vmem:[#allocation12 + $0x38] sm:$0xff] }
 0x158   :  { %4369 = vmatprep.subr.bf16.mxu0 %v4839_v2 }
 0x21d   :  { %v349_v53 = vpop.f32.mrb[0].mxu1  ;;  %v427_v54 = vpop.f32.mrb[2].mxu0 }
 0x21e   :  { %v3789_v56 = vpop.f32.mrb[1].mxu1  ;;  %v3808_v57 = vpop.f32.mrb[3].mxu0  ;;  %3809 = vmatprep.subr.mxu1 %v427_v54 }
 0x21f   :  { %3810 = vmatpush3.msra.mxu1 %v427_v54  ;;  %v4385_v56 = vpack.c.bf16 %v948_v52, %v947_v51  ;;  %v949_v57 = vld [vmem:[#allocation12 + $0x20] sm:$0xff]  ;;  %v1364_v52 = vld [vmem:[#allocation8 + $0x68] sm:$0xff] }
 0x220   :  { %3812 = vmatmul.mubr.msk.f32.vlgmr.msra.gmra.mrb[2].mxu1 %vm431_vm4, %v5103_v58  ;;  %3814 = vmatprep.subr.mxu1 %v349_v53  ;;  %v4388_v61 = vpack.c.bf16 %v950_v59, %v949_v57  ;;  %v1363_v51 = vld [vmem:[#allocation8 + $0x60] sm:$0xff] }
 0x221   :  { %3815 = vmatpush3.msra.mxu1 %v349_v53  ;;  %3816 = vmatprep.mubr.msk.f32.mxu1 %vm431_vm4, %v5100_v55 }
 0x222   :  { %4354 = vmatprep.subr.bf16.mxu1 %v4839_v2 }
 0x228   :  { %3817 = vmatmul.mubr.msk.f32.vlgmr.msra.gmra.mrb[2].mxu1 %vm431_vm4, %v5111_v60 }
 0x229   :  { %3842 = vmatprep.mubr.msk.f32.mxu1 %vm4838_vm0, %v4837_v1 }
 0x2fb   :  { %v3818_v3 = vpop.f32.mrb[2].mxu1 }
 0x2fc   :  { %v602_v4 = vadd.f32 %v3818_v3, %v3428_v0  ;;  %v585_v5 = vpop.f32.mrb[3].mxu1  ;;  %v1036_v3 = vld [vmem:[#allocation3 + $0x40] sm:$0xff] }
 0x2fd   :  { %v601_v8 = vadd.f32 %v3428_v0, %v585_v5  ;;  %v4391_v0 = vpack.c.bf16 %v952_v63, %v951_v62  ;;  %v3445_v62 = vld [vmem:[%s5419_s8 + $0x1] ss:$0 sm:$0xff] }
 0x2fe   :  { %v604_v11 = vmax.f32 %v602_v4, 0.0  ;;  %v1037_v4 = vld [vmem:[#allocation3 + $0x48] sm:$0xff] }
 0x2ff   :  { %v603_v9 = vmax.f32 %v601_v8, 0.0  ;;  %v4394_v5 = vpack.c.bf16 %v1037_v4, %v1036_v3  ;;  %v4397_v8 = vpack.c.bf16 %v1039_v7, %v1038_v6  ;;  %v1529_v6 = vld [vmem:[#allocation9 + $0x40] sm:$0xff]  ;;  %v1530_v7 = vld [vmem:[#allocation9 + $0x48] sm:$0xff] }
 0x301   :  { %3835 = vmatprep.mubr.msk.f32.mxu0 %vm279_vm3, %v603_v9 }
 0x302   :  { %3836 = vmatmul.mubr.msk.f32.vlgmr.msra.gmra.mrb[4].mxu0 %vm279_vm3, %v604_v11 }
 0x303   :  { %4371 = vmatpush3.bf16.msra.mxu0 %v4370_v10  ;;  %3880 = vmatprep.mubr.msk.f32.mxu0 %vm4838_vm0, %v4837_v1  ;;  %v3435_v10 = vld [vmem:[%s5424_s13] ss:$0 sm:$0xff] }
 0x304   :  { %4372 = vmatprep.subr.bf16.mxu0 %v4839_v2 }
 0x307   :  { %4374 = vmatpush3.bf16.msra.mxu0 %v4373_v14  ;;  %v1119_v14 = vld [vmem:[#allocation6 + $0x48] sm:$0xff] }
 0x308   :  { %4375 = vmatprep.subr.bf16.mxu0 %v4839_v2  ;;  %v4406_v16 = vpack.c.bf16 %v1119_v14, %v1118_v13  ;;  %v1532_v13 = vld [vmem:[#allocation9 + $0x58] sm:$0xff] }
 0x30b   :  { %4377 = vmatpush3.bf16.msra.mxu0 %v4376_v17 }
 0x30c   :  { %4378 = vmatprep.subr.bf16.mxu0 %v4839_v2 }
 0x30f   :  { %4380 = vmatpush3.bf16.msra.mxu0 %v4379_v20  ;;  %v4409_v20 = vpack.c.bf16 %v1121_v19, %v1120_v18  ;;  %v1535_v18 = vld [vmem:[#allocation9 + $0x70] sm:$0xff]  ;;  %v1536_v19 = vld [vmem:[#allocation9 + $0x78] sm:$0xff] }
 0x310   :  { %4393 = vmatprep.subr.bf16.mxu0 %v4839_v2 }
 0x312   :  { %3881 = vmatmul.mubr.msk.f32.vlgmr.msra.gmra.mrb[6].mxu0 %vm279_vm3, %v5087_v37 }
 0x313   :  { %3918 = vmatprep.mubr.msk.f32.mxu0 %vm4838_vm0, %v4837_v1  ;;  %4395 = vmatpush3.bf16.msra.mxu0 %v4394_v5 }
 0x314   :  { %4396 = vmatprep.subr.bf16.mxu0 %v4839_v2 }
 0x317   :  { %4398 = vmatpush3.bf16.msra.mxu0 %v4397_v8 }
 0x318   :  { %4399 = vmatprep.subr.bf16.mxu0 %v4839_v2 }
 0x3d5   :  { %v3837_v22 = vpop.f32.mrb[4].mxu0 }
 0x3d6   :  { %v698_v23 = vadd.f32 %v3837_v22, %v3429_v21  ;;  %v692_v24 = vpop.f32.mrb[5].mxu0  ;;  %v1041_v22 = vld [vmem:[#allocation3 + $0x68] sm:$0xff] }
 0x3d7   :  { %v693_v26 = vadd.f32 %v3429_v21, %v692_v24  ;;  %v1040_v21 = vld [vmem:[#allocation3 + $0x60] sm:$0xff] }
 0x3d8   :  { %v702_v28 = vmax.f32 %v698_v23, 0.0  ;;  %v1122_v23 = vld [vmem:[#allocation6 + $0x60] sm:$0xff]  ;;  %v4400_v24 = vpack.c.bf16 %v1041_v22, %v1040_v21 }
 0x3d9   :  { %v701_v29 = vmax.f32 %v693_v26, 0.0  ;;  %v4412_v26 = vpack.c.bf16 %v1123_v25, %v1122_v23  ;;  %v3447_v21 = vld [vmem:[%s5421_s10 + $0x1] ss:$0 sm:$0xff] }
 0x3da   :  { %4401 = vmatpush3.bf16.msra.mxu0 %v4400_v24 }
 0x3db   :  { %v4355_v32 = vpack.c.bf16 %v702_v28, %v701_v29  ;;  %4402 = vmatprep.subr.bf16.mxu0 %v4839_v2  ;;  %v1043_v28 = vld [vmem:[#allocation3 + $0x78] sm:$0xff]  ;;  %v1124_v29 = vld [vmem:[#allocation6 + $0x70] sm:$0xff] }
 0x3dc   :  { %v4403_v30 = vpack.c.bf16 %v1043_v28, %v1042_v27  ;;  %v1538_v28 = vld [vmem:[#allocation11 + $0x40] sm:$0xff] }
 0x3dd   :  { %4356 = vmatpush3.bf16.msra.mxu1 %v4355_v32  ;;  %v4415_v32 = vpack.c.bf16 %v1125_v31, %v1124_v29  ;;  %v1539_v29 = vld [vmem:[#allocation11 + $0x48] sm:$0xff] }
 0x3de   :  { %4357 = vmatprep.subr.bf16.mxu1 %v4839_v2  ;;  %4404 = vmatpush3.bf16.msra.mxu0 %v4403_v30  ;;  %v4437_v31 = vpack.c.bf16 %v1539_v29, %v1538_v28  ;;  %v1881_v29 = vld [vmem:[#allocation6 + $0xb8] sm:$0xff] }
 0x3e0   :  { %3843 = vmatmul.mubr.msk.f32.vlgmr.msra.gmra.mrb[4].mxu1 %vm703_vm10, %v5141_v33 }
 0x3e1   :  { %4359 = vmatpush3.bf16.msra.mxu1 %v4358_v35  ;;  %3861 = vmatprep.mubr.msk.f32.mxu1 %vm4838_vm0, %v4837_v1  ;;  %v3436_v35 = vld [vmem:[%s5426_s15] ss:$0 sm:$0xff] }
 0x3e2   :  { %4360 = vmatprep.subr.bf16.mxu1 %v4839_v2 }
 0x3e5   :  { %v932_v42 = vpop.f32.mrb[6].mxu0  ;;  %4362 = vmatpush3.bf16.msra.mxu1 %v4361_v38 }
 0x3e6   :  { %v3882_v44 = vpop.f32.mrb[7].mxu0  ;;  %4363 = vmatprep.subr.bf16.mxu1 %v4839_v2 }
 0x3e7   :  { %v1361_v44 = vld [vmem:[#allocation8 + $0x50] sm:$0xff] }
 0x3e9   :  { %4365 = vmatpush3.bf16.msra.mxu1 %v4364_v43  ;;  %v1360_v43 = vld [vmem:[#allocation8 + $0x48] sm:$0xff] }
 0x3ea   :  { %4366 = vmatprep.subr.bf16.mxu1 %v4839_v2 }
 0x3ed   :  { %4368 = vmatpush3.bf16.msra.mxu1 %v4367_v47 }
 0x3ee   :  { %4381 = vmatprep.subr.bf16.mxu1 %v4839_v2 }
 0x4b3   :  { %v773_v53 = vpop.f32.mrb[4].mxu1 }
 0x4b4   :  { %v3844_v54 = vpop.f32.mrb[5].mxu1  ;;  %3862 = vmatmul.mubr.msk.f32.vlgmr.msra.gmra.mrb[6].mxu1 %vm279_vm3, %v773_v53  ;;  %v4425_v53 = vpack.c.bf16 %v1364_v52, %v1363_v51 }
 0x4b5   :  { %4383 = vmatpush3.bf16.msra.mxu1 %v4382_v50  ;;  %3899 = vmatprep.mubr.msk.f32.mxu1 %vm4838_vm0, %v4837_v1  ;;  %v4421_v50 = vpack.c.bf16 %v1362_v45, %v1361_v44  ;;  %v1365_v54 = vld [vmem:[#allocation8 + $0x70] sm:$0xff]  ;;  %v1545_v45 = vld [vmem:[#allocation11 + $0x78] sm:$0xff] }
 0x4b6   :  { %4384 = vmatprep.subr.bf16.mxu1 %v4839_v2  ;;  %v1544_v44 = vld [vmem:[#allocation11 + $0x70] sm:$0xff] }
 0x4b9   :  { %4386 = vmatpush3.bf16.msra.mxu1 %v4385_v56  ;;  %v1366_v56 = vld [vmem:[#allocation8 + $0x78] sm:$0xff] }
 0x4ba   :  { %4387 = vmatprep.subr.bf16.mxu1 %v4839_v2  ;;  %v4429_v57 = vpack.c.bf16 %v1366_v56, %v1365_v54  ;;  %v1704_v54 = vld [vmem:[#allocation12 + $0x60] sm:$0xff]  ;;  %v1705_v56 = vld [vmem:[#allocation12 + $0x68] sm:$0xff] }
 0x4bd   :  { %4389 = vmatpush3.bf16.msra.mxu1 %v4388_v61 }
 0x4be   :  { %4390 = vmatprep.subr.bf16.mxu1 %v4839_v2 }
 0x4c1   :  { %4392 = vmatpush3.bf16.msra.mxu1 %v4391_v0 }
 0x4c2   :  { %4405 = vmatprep.subr.bf16.mxu1 %v4839_v2 }
 0x587   :  { %v862_v9 = vpop.f32.mrb[6].mxu1 }
 0x588   :  { %v933_v11 = vadd.f32 %v932_v42, %v862_v9  ;;  %v3863_v12 = vpop.f32.mrb[7].mxu1  ;;  %v1359_v42 = vld [vmem:[#allocation8 + $0x40] sm:$0xff] }
 0x589   :  { %v1531_v12 = vld [vmem:[#allocation9 + $0x50] sm:$0xff] }
 0x58a   :  { %v943_v15 = vadd.f32 %v3435_v10, %v933_v11  ;;  %v4449_v10 = vpack.c.bf16 %v1530_v7, %v1529_v6  ;;  %v4452_v14 = vpack.c.bf16 %v1532_v13, %v1531_v12  ;;  %v1875_v12 = vld [vmem:[#allocation6 + $0x88] sm:$0xff] }
 0x58c   :  { %v944_v17 = vmax.f32 %v943_v15, 0.0  ;;  %v1533_v15 = vld [vmem:[#allocation9 + $0x60] sm:$0xff] }
 0x58e   :  { %3900 = vmatmul.mubr.msk.f32.vlgmr.msra.gmra.mrb[8].mxu1 %vm279_vm3, %v944_v17 }
 0x58f   :  { %4407 = vmatpush3.bf16.msra.mxu1 %v4406_v16  ;;  %3937 = vmatprep.mubr.msk.f32.mxu1 %vm4838_vm0, %v4837_v1  ;;  %v1534_v16 = vld [vmem:[#allocation9 + $0x68] sm:$0xff] }
 0x590   :  { %4408 = vmatprep.subr.bf16.mxu1 %v4839_v2  ;;  %v4455_v17 = vpack.c.bf16 %v1534_v16, %v1533_v15  ;;  %v1876_v16 = vld [vmem:[#allocation6 + $0x90] sm:$0xff] }
 0x593   :  { %4410 = vmatpush3.bf16.msra.mxu1 %v4409_v20  ;;  %v4458_v20 = vpack.c.bf16 %v1536_v19, %v1535_v18  ;;  %v1796_v19 = vld [vmem:[#allocation3 + $0xa0] sm:$0xff] }
 0x594   :  { %4411 = vmatprep.subr.bf16.mxu1 %v4839_v2 }
 0x597   :  { %4413 = vmatpush3.bf16.msra.mxu1 %v4412_v26 }
 0x598   :  { %4414 = vmatprep.subr.bf16.mxu1 %v4839_v2 }
 0x59b   :  { %4416 = vmatpush3.bf16.msra.mxu1 %v4415_v32  ;;  %v1540_v32 = vld [vmem:[#allocation11 + $0x50] sm:$0xff] }
 0x661   :  { %v1029_v34 = vpop.f32.mrb[8].mxu1 }
 0x662   :  { %v1030_v36 = vadd.f32 %v3436_v35, %v1029_v34  ;;  %v3901_v38 = vpop.f32.mrb[9].mxu1  ;;  %v1541_v35 = vld [vmem:[#allocation11 + $0x58] sm:$0xff] }
 0x663   :  { %v4440_v34 = vpack.c.bf16 %v1541_v35, %v1540_v32  ;;  %v1543_v38 = vld [vmem:[#allocation11 + $0x68] sm:$0xff] }
 0x664   :  { %v1033_v39 = vmax.f32 %v1030_v36, 0.0  ;;  %v1542_v36 = vld [vmem:[#allocation11 + $0x60] sm:$0xff] }
 0x666   :  { %v5175_v40 = vadd.f32 %v1033_v39, %v5087_v37  ;;  %v4417_v37 = vpack.c.bf16 %v1360_v43, %v1359_v42  ;;  %v4443_v42 = vpack.c.bf16 %v1543_v38, %v1542_v36 }
 0x668   :  { %3919 = vmatmul.mubr.msk.f32.vlgmr.msra.gmra.mrb[8].mxu0 %vm279_vm3, %v5175_v40  ;;  %3938 = vmatmul.mubr.msk.f32.vlgmr.msra.gmra.mrb[10].mxu1 %vm279_vm3, %v5175_v40 }
 0x669   :  { %3942 = vmatprep.mubr.msk.f32.mxu1 %vm431_vm4, %v5095_v41  ;;  %3947 = vmatprep.mubr.msk.f32.mxu0 %vm431_vm4, %v5100_v55 }
 0x73b   :  { %v1113_v46 = vpop.f32.mrb[8].mxu0  ;;  %v1192_v47 = vpop.f32.mrb[10].mxu1 }
 0x73c   :  { %v3920_v48 = vpop.f32.mrb[9].mxu0  ;;  %v3939_v49 = vpop.f32.mrb[11].mxu1  ;;  %3940 = vmatprep.subr.mxu1 %v1192_v47  ;;  %3945 = vmatprep.subr.mxu0 %v1113_v46 }
 0x73d   :  { %3941 = vmatpush3.msra.mxu1 %v1192_v47  ;;  %3946 = vmatpush3.msra.mxu0 %v1113_v46  ;;  %v4446_v46 = vpack.c.bf16 %v1545_v45, %v1544_v44  ;;  %v1700_v47 = vld [vmem:[#allocation12 + $0x40] sm:$0xff]  ;;  %v1702_v49 = vld [vmem:[#allocation12 + $0x50] sm:$0xff]  ;;  %v2118_v45 = vld [vmem:[#allocation8 + $0x98] sm:$0xff] }
 0x73e   :  { %3943 = vmatmul.mubr.msk.f32.vlgmr.msra.gmra.mrb[12].mxu1 %vm431_vm4, %v5103_v58  ;;  %3948 = vmatmul.mubr.msk.f32.vlgmr.msra.gmra.mrb[10].mxu0 %vm431_vm4, %v5111_v60 }
 0x73f   :  { %4418 = vmatprep.subr.bf16.mxu0 %v4417_v37  ;;  %4433 = vmatprep.subr.bf16.mxu1 %v4839_v2 }
 0x740   :  { %4420 = vmatpush3.bf16.msra.mxu0 %v4417_v37  ;;  %3973 = vmatprep.mubr.msk.f32.mxu1 %vm4838_vm0, %v4837_v1  ;;  %v1701_v37 = vld [vmem:[#allocation12 + $0x48] sm:$0xff] }
 0x741   :  { %4422 = vmatprep.subr.bf16.mxu0 %v4421_v50  ;;  %v4461_v48 = vpack.c.bf16 %v1701_v37, %v1700_v47  ;;  %v2119_v47 = vld [vmem:[#allocation8 + $0xa0] sm:$0xff]  ;;  %v2120_v37 = vld [vmem:[#allocation8 + $0xa8] sm:$0xff] }
 0x744   :  { %4424 = vmatpush3.bf16.msra.mxu0 %v4421_v50  ;;  %v1703_v50 = vld [vmem:[#allocation12 + $0x58] sm:$0xff] }
 0x745   :  { %4426 = vmatprep.subr.bf16.mxu0 %v4425_v53 }
 0x748   :  { %4428 = vmatpush3.bf16.msra.mxu0 %v4425_v53  ;;  %v4464_v53 = vpack.c.bf16 %v1703_v50, %v1702_v49 }
 0x749   :  { %4430 = vmatprep.subr.bf16.mxu0 %v4429_v57 }
 0x74c   :  { %4432 = vmatpush3.bf16.msra.mxu0 %v4429_v57  ;;  %v4467_v57 = vpack.c.bf16 %v1705_v56, %v1704_v54  ;;  %v3465_v56 = vld [vmem:[%s5419_s8 + $0x2] ss:$0 sm:$0xff] }
 0x74d   :  { %4448 = vmatprep.subr.bf16.mxu0 %v4839_v2 }
 0x811   :  { %v3944_v59 = vpop.f32.mrb[12].mxu1  ;;  %v3949_v61 = vpop.f32.mrb[10].mxu0 }
 0x812   :  { %v1343_v63 = vadd.f32 %v3949_v61, %v3944_v59  ;;  %v1262_v0 = vpop.f32.mrb[13].mxu1  ;;  %v1337_v3 = vpop.f32.mrb[11].mxu0  ;;  %v1706_v59 = vld [vmem:[#allocation12 + $0x70] sm:$0xff]  ;;  %v1707_v61 = vld [vmem:[#allocation12 + $0x78] sm:$0xff] }
 0x813   :  { %v1338_v4 = vadd.f32 %v1337_v3, %v1262_v0  ;;  %v1793_v0 = vld [vmem:[#allocation3 + $0x88] sm:$0xff] }
 0x814   :  { %v1355_v5 = vadd.f32 %v3445_v62, %v1343_v63  ;;  %v1792_v63 = vld [vmem:[#allocation3 + $0x80] sm:$0xff] }
 0x815   :  { %v1354_v8 = vadd.f32 %v3445_v62, %v1338_v4  ;;  %v4470_v62 = vpack.c.bf16 %v1707_v61, %v1706_v59  ;;  %v4473_v3 = vpack.c.bf16 %v1793_v0, %v1792_v63  ;;  %v1794_v4 = vld [vmem:[#allocation3 + $0x90] sm:$0xff]  ;;  %v2286_v63 = vld [vmem:[#allocation9 + $0x88] sm:$0xff] }
 0x816   :  { %v1357_v11 = vmax.f32 %v1355_v5, 0.0  ;;  %v1795_v5 = vld [vmem:[#allocation3 + $0x98] sm:$0xff] }
 0x817   :  { %v1356_v9 = vmax.f32 %v1354_v8, 0.0  ;;  %v4476_v6 = vpack.c.bf16 %v1795_v5, %v1794_v4  ;;  %v3454_v8 = vld [vmem:[%s5424_s13 + $0x1] ss:$0 sm:$0xff] }
 0x819   :  { %3966 = vmatprep.mubr.msk.f32.mxu0 %vm279_vm3, %v1356_v9 }
 0x81a   :  { %3967 = vmatmul.mubr.msk.f32.vlgmr.msra.gmra.mrb[12].mxu0 %vm279_vm3, %v1357_v11  ;;  %v1874_v11 = vld [vmem:[#allocation6 + $0x80] sm:$0xff] }
 0x81b   :  { %4450 = vmatpush3.bf16.msra.mxu0 %v4449_v10  ;;  %4011 = vmatprep.mubr.msk.f32.mxu0 %vm4838_vm0, %v4837_v1 }
 0x81c   :  { %4451 = vmatprep.subr.bf16.mxu0 %v4839_v2 }
 0x81f   :  { %4453 = vmatpush3.bf16.msra.mxu0 %v4452_v14  ;;  %v4485_v14 = vpack.c.bf16 %v1875_v12, %v1874_v11  ;;  %v2291_v12 = vld [vmem:[#allocation9 + $0xb0] sm:$0xff] }
 0x820   :  { %4454 = vmatprep.subr.bf16.mxu0 %v4839_v2 }
 0x823   :  { %4456 = vmatpush3.bf16.msra.mxu0 %v4455_v17  ;;  %v1877_v17 = vld [vmem:[#allocation6 + $0x98] sm:$0xff] }
 0x824   :  { %4457 = vmatprep.subr.bf16.mxu0 %v4839_v2  ;;  %v4488_v18 = vpack.c.bf16 %v1877_v17, %v1876_v16 }
 0x827   :  { %4459 = vmatpush3.bf16.msra.mxu0 %v4458_v20  ;;  %v1797_v20 = vld [vmem:[#allocation3 + $0xa8] sm:$0xff] }
 0x828   :  { %4472 = vmatprep.subr.bf16.mxu0 %v4839_v2 }
 0x82a   :  { %4012 = vmatmul.mubr.msk.f32.vlgmr.msra.gmra.mrb[14].mxu0 %vm279_vm3, %v5175_v40 }
 0x82b   :  { %4049 = vmatprep.mubr.msk.f32.mxu0 %vm4838_vm0, %v4837_v1  ;;  %4474 = vmatpush3.bf16.msra.mxu0 %v4473_v3 }
 0x82c   :  { %4475 = vmatprep.subr.bf16.mxu0 %v4839_v2 }
 0x82f   :  { %4477 = vmatpush3.bf16.msra.mxu0 %v4476_v6  ;;  %v2287_v6 = vld [vmem:[#allocation9 + $0x90] sm:$0xff] }
 0x830   :  { %4478 = vmatprep.subr.bf16.mxu0 %v4839_v2 }
 0x8ed   :  { %v3968_v22 = vpop.f32.mrb[12].mxu0 }
 0x8ee   :  { %v1453_v23 = vadd.f32 %v3968_v22, %v3447_v21  ;;  %v1447_v24 = vpop.f32.mrb[13].mxu0  ;;  %v4479_v22 = vpack.c.bf16 %v1797_v20, %v1796_v19 }
 0x8ef   :  { %v1448_v25 = vadd.f32 %v3447_v21, %v1447_v24  ;;  %v1878_v21 = vld [vmem:[#allocation6 + $0xa0] sm:$0xff] }
 0x8f0   :  { %v1457_v26 = vmax.f32 %v1453_v23, 0.0  ;;  %v1879_v23 = vld [vmem:[#allocation6 + $0xa8] sm:$0xff]  ;;  %4480 = vmatpush3.bf16.msra.mxu0 %v4479_v22  ;;  %v2294_v22 = vld [vmem:[#allocation11 + $0x80] sm:$0xff] }
 0x8f1   :  { %v1456_v27 = vmax.f32 %v1448_v25, 0.0  ;;  %v4491_v24 = vpack.c.bf16 %v1879_v23, %v1878_v21  ;;  %4481 = vmatprep.subr.bf16.mxu0 %v4839_v2  ;;  %v1798_v25 = vld [vmem:[#allocation3 + $0xb0] sm:$0xff]  ;;  %v2295_v23 = vld [vmem:[#allocation11 + $0x88] sm:$0xff] }
 0x8f3   :  { %v4434_v30 = vpack.c.bf16 %v1457_v26, %v1456_v27  ;;  %v1799_v26 = vld [vmem:[#allocation3 + $0xb8] sm:$0xff]  ;;  %v1880_v27 = vld [vmem:[#allocation6 + $0xb0] sm:$0xff] }
 0x8f4   :  { %v4482_v28 = vpack.c.bf16 %v1799_v26, %v1798_v25  ;;  %v4516_v25 = vpack.c.bf16 %v2295_v23, %v2294_v22  ;;  %v2296_v26 = vld [vmem:[#allocation11 + $0x90] sm:$0xff]  ;;  %v2637_v23 = vld [vmem:[#allocation6 + $0xf8] sm:$0xff] }
 0x8f5   :  { %4435 = vmatpush3.bf16.msra.mxu1 %v4434_v30  ;;  %v4494_v30 = vpack.c.bf16 %v1881_v29, %v1880_v27  ;;  %v2297_v27 = vld [vmem:[#allocation11 + $0x98] sm:$0xff]  ;;  %v2298_v29 = vld [vmem:[#allocation11 + $0xa0] sm:$0xff] }
 0x8f6   :  { %4436 = vmatprep.subr.bf16.mxu1 %v4839_v2  ;;  %4483 = vmatpush3.bf16.msra.mxu0 %v4482_v28  ;;  %v4519_v28 = vpack.c.bf16 %v2297_v27, %v2296_v26 }
 0x8f8   :  { %3974 = vmatmul.mubr.msk.f32.vlgmr.msra.gmra.mrb[14].mxu1 %vm703_vm10, %v5141_v33 }
 0x8f9   :  { %4438 = vmatpush3.bf16.msra.mxu1 %v4437_v31  ;;  %3992 = vmatprep.mubr.msk.f32.mxu1 %vm4838_vm0, %v4837_v1  ;;  %v3456_v31 = vld [vmem:[%s5426_s15 + $0x1] ss:$0 sm:$0xff] }
 0x8fa   :  { %4439 = vmatprep.subr.bf16.mxu1 %v4839_v2 }
 0x8fd   :  { %v1685_v39 = vpop.f32.mrb[14].mxu0  ;;  %4441 = vmatpush3.bf16.msra.mxu1 %v4440_v34 }
 0x8fe   :  { %v4013_v43 = vpop.f32.mrb[15].mxu0  ;;  %4442 = vmatprep.subr.bf16.mxu1 %v4839_v2 }
 0x8ff   :  { %v2117_v43 = vld [vmem:[#allocation8 + $0x90] sm:$0xff] }
 0x901   :  { %4444 = vmatpush3.bf16.msra.mxu1 %v4443_v42  ;;  %v2116_v42 = vld [vmem:[#allocation8 + $0x88] sm:$0xff] }
 0x902   :  { %4445 = vmatprep.subr.bf16.mxu1 %v4839_v2 }
 0x905   :  { %4447 = vmatpush3.bf16.msra.mxu1 %v4446_v46  ;;  %v4500_v46 = vpack.c.bf16 %v2118_v45, %v2117_v43  ;;  %v2457_v43 = vld [vmem:[#allocation12 + $0x88] sm:$0xff]  ;;  %v2458_v45 = vld [vmem:[#allocation12 + $0x90] sm:$0xff] }
 0x906   :  { %4460 = vmatprep.subr.bf16.mxu1 %v4839_v2 }
 0x9cb   :  { %v1524_v51 = vpop.f32.mrb[14].mxu1 }
 0x9cc   :  { %v3975_v52 = vpop.f32.mrb[15].mxu1  ;;  %3993 = vmatmul.mubr.msk.f32.vlgmr.msra.gmra.mrb[16].mxu1 %vm279_vm3, %v1524_v51 }
 0x9cd   :  { %4462 = vmatpush3.bf16.msra.mxu1 %v4461_v48  ;;  %4030 = vmatprep.mubr.msk.f32.mxu1 %vm4838_vm0, %v4837_v1  ;;  %v2121_v52 = vld [vmem:[#allocation8 + $0xb0] sm:$0xff] }
 0x9ce   :  { %4463 = vmatprep.subr.bf16.mxu1 %v4839_v2 }
 0x9d1   :  { %4465 = vmatpush3.bf16.msra.mxu1 %v4464_v53  ;;  %v2122_v53 = vld [vmem:[#allocation8 + $0xb8] sm:$0xff] }
 0x9d2   :  { %4466 = vmatprep.subr.bf16.mxu1 %v4839_v2  ;;  %v4508_v54 = vpack.c.bf16 %v2122_v53, %v2121_v52  ;;  %v2463_v52 = vld [vmem:[#allocation12 + $0xb8] sm:$0xff] }
 0x9d5   :  { %4468 = vmatpush3.bf16.msra.mxu1 %v4467_v57 }
 0x9d6   :  { %4469 = vmatprep.subr.bf16.mxu1 %v4839_v2 }
 0x9d9   :  { %4471 = vmatpush3.bf16.msra.mxu1 %v4470_v62  ;;  %v2285_v62 = vld [vmem:[#allocation9 + $0x80] sm:$0xff] }
 0x9da   :  { %4484 = vmatprep.subr.bf16.mxu1 %v4839_v2  ;;  %v4528_v4 = vpack.c.bf16 %v2286_v63, %v2285_v62 }
 0xa9f   :  { %v1615_v7 = vpop.f32.mrb[16].mxu1 }
 0xaa0   :  { %v1686_v9 = vadd.f32 %v1685_v39, %v1615_v7  ;;  %v3994_v10 = vpop.f32.mrb[17].mxu1  ;;  %v2115_v39 = vld [vmem:[#allocation8 + $0x80] sm:$0xff]  ;;  %v2288_v7 = vld [vmem:[#allocation9 + $0x98] sm:$0xff] }
 0xaa1   :  { %v4496_v44 = vpack.c.bf16 %v2116_v42, %v2115_v39  ;;  %v2290_v10 = vld [vmem:[#allocation9 + $0xa8] sm:$0xff]  ;;  %v2456_v42 = vld [vmem:[#allocation12 + $0x80] sm:$0xff] }
 0xaa2   :  { %v1697_v13 = vadd.f32 %v3454_v8, %v1686_v9  ;;  %v4531_v8 = vpack.c.bf16 %v2288_v7, %v2287_v6  ;;  %v2289_v9 = vld [vmem:[#allocation9 + $0xa0] sm:$0xff]  ;;  %v2631_v6 = vld [vmem:[#allocation6 + $0xc8] sm:$0xff] }
 0xaa3   :  { %v4534_v11 = vpack.c.bf16 %v2290_v10, %v2289_v9  ;;  %v2632_v10 = vld [vmem:[#allocation6 + $0xd0] sm:$0xff] }
 0xaa4   :  { %v1698_v15 = vmax.f32 %v1697_v13, 0.0  ;;  %v2292_v13 = vld [vmem:[#allocation9 + $0xb8] sm:$0xff] }
 0xaa6   :  { %4031 = vmatmul.mubr.msk.f32.vlgmr.msra.gmra.mrb[18].mxu1 %vm279_vm3, %v1698_v15  ;;  %v3467_v15 = vld [vmem:[%s5421_s10 + $0x2] ss:$0 sm:$0xff] }
 0xaa7   :  { %4486 = vmatpush3.bf16.msra.mxu1 %v4485_v14  ;;  %4068 = vmatprep.mubr.msk.f32.mxu1 %vm4838_vm0, %v4837_v1  ;;  %v4537_v14 = vpack.c.bf16 %v2292_v13, %v2291_v12  ;;  %v2552_v13 = vld [vmem:[#allocation3 + $0xe0] sm:$0xff] }
 0xaa8   :  { %4487 = vmatprep.subr.bf16.mxu1 %v4839_v2 }
 0xaab   :  { %4489 = vmatpush3.bf16.msra.mxu1 %v4488_v18 }
 0xaac   :  { %4490 = vmatprep.subr.bf16.mxu1 %v4839_v2 }
 0xaaf   :  { %4492 = vmatpush3.bf16.msra.mxu1 %v4491_v24 }
 0xab0   :  { %4493 = vmatprep.subr.bf16.mxu1 %v4839_v2 }
 0xab3   :  { %4495 = vmatpush3.bf16.msra.mxu1 %v4494_v30  ;;  %v2299_v30 = vld [vmem:[#allocation11 + $0xa8] sm:$0xff] }
 0xab4   :  { %4497 = vmatprep.subr.bf16.mxu1 %v4496_v44 }
 0xb79   :  { %v1785_v32 = vpop.f32.mrb[18].mxu1 }
 0xb7a   :  { %v1786_v35 = vadd.f32 %v3456_v31, %v1785_v32  ;;  %v4032_v34 = vpop.f32.mrb[19].mxu1  ;;  %v4522_v32 = vpack.c.bf16 %v2299_v30, %v2298_v29 }
 0xb7b   :  { %v2300_v34 = vld [vmem:[#allocation11 + $0xb0] sm:$0xff] }
 0xb7c   :  { %v1789_v36 = vmax.f32 %v1786_v35, 0.0 }
 0xb7e   :  { %v5243_v38 = vadd.f32 %v1789_v36, %v5175_v40  ;;  %v4504_v40 = vpack.c.bf16 %v2120_v37, %v2119_v47  ;;  %v2301_v36 = vld [vmem:[#allocation11 + $0xb8] sm:$0xff] }
 0xb7f   :  { %v4525_v39 = vpack.c.bf16 %v2301_v36, %v2300_v34  ;;  %v2874_v36 = vld [vmem:[#allocation8 + $0xd8] sm:$0xff] }
 0xb80   :  { %4050 = vmatmul.mubr.msk.f32.vlgmr.msra.gmra.mrb[16].mxu0 %vm279_vm3, %v5243_v38  ;;  %4069 = vmatmul.mubr.msk.f32.vlgmr.msra.gmra.mrb[20].mxu1 %vm279_vm3, %v5243_v38 }
 0xb81   :  { %4073 = vmatprep.mubr.msk.f32.mxu0 %vm431_vm4, %v5095_v41  ;;  %4499 = vmatpush3.bf16.msra.mxu1 %v4496_v44  ;;  %v4540_v44 = vpack.c.bf16 %v2457_v43, %v2456_v42  ;;  %v2875_v42 = vld [vmem:[#allocation8 + $0xe0] sm:$0xff]  ;;  %v2876_v43 = vld [vmem:[#allocation8 + $0xe8] sm:$0xff] }
 0xb82   :  { %4501 = vmatprep.subr.bf16.mxu1 %v4500_v46 }
 0xb85   :  { %4503 = vmatpush3.bf16.msra.mxu1 %v4500_v46  ;;  %v2459_v46 = vld [vmem:[#allocation12 + $0x98] sm:$0xff] }
 0xb86   :  { %4505 = vmatprep.subr.bf16.mxu1 %v4504_v40 }
 0xb89   :  { %4507 = vmatpush3.bf16.msra.mxu1 %v4504_v40  ;;  %v4543_v40 = vpack.c.bf16 %v2459_v46, %v2458_v45 }
 0xb8a   :  { %4509 = vmatprep.subr.bf16.mxu1 %v4508_v54 }
 0xb8d   :  { %4511 = vmatpush3.bf16.msra.mxu1 %v4508_v54  ;;  %v2548_v54 = vld [vmem:[#allocation3 + $0xc0] sm:$0xff] }
 0xb8e   :  { %4527 = vmatprep.subr.bf16.mxu1 %v4839_v2 }
 0xc53   :  { %v1869_v48 = vpop.f32.mrb[16].mxu0  ;;  %v1948_v49 = vpop.f32.mrb[20].mxu1 }
 0xc54   :  { %v4051_v50 = vpop.f32.mrb[17].mxu0  ;;  %v4070_v51 = vpop.f32.mrb[21].mxu1  ;;  %4071 = vmatprep.subr.mxu0 %v1948_v49 }
 0xc55   :  { %4072 = vmatpush3.msra.mxu0 %v1948_v49  ;;  %v2461_v49 = vld [vmem:[#allocation12 + $0xa8] sm:$0xff]  ;;  %v2462_v51 = vld [vmem:[#allocation12 + $0xb0] sm:$0xff] }
 0xc56   :  { %4074 = vmatmul.mubr.msk.f32.vlgmr.msra.gmra.mrb[18].mxu0 %vm431_vm4, %v5103_v58  ;;  %4076 = vmatprep.subr.mxu0 %v1869_v48  ;;  %v4549_v53 = vpack.c.bf16 %v2463_v52, %v2462_v51  ;;  %v3042_v51 = vld [vmem:[#allocation9 + $0xc8] sm:$0xff] }
 0xc57   :  { %4077 = vmatpush3.msra.mxu0 %v1869_v48  ;;  %4078 = vmatprep.mubr.msk.f32.mxu0 %vm431_vm4, %v5100_v55  ;;  %v2460_v48 = vld [vmem:[#allocation12 + $0xa0] sm:$0xff] }
 0xc58   :  { %4512 = vmatprep.subr.bf16.mxu0 %v4839_v2  ;;  %v4546_v50 = vpack.c.bf16 %v2461_v49, %v2460_v48 }
 0xc5e   :  { %4079 = vmatmul.mubr.msk.f32.vlgmr.msra.gmra.mrb[18].mxu0 %vm431_vm4, %v5111_v60 }
 0xc5f   :  { %4104 = vmatprep.mubr.msk.f32.mxu0 %vm4838_vm0, %v4837_v1 }
 0xd31   :  { %v4080_v57 = vpop.f32.mrb[18].mxu0 }
 0xd32   :  { %v2111_v59 = vadd.f32 %v4080_v57, %v3465_v56  ;;  %v2093_v61 = vpop.f32.mrb[19].mxu0 }
 0xd33   :  { %v2110_v0 = vadd.f32 %v3465_v56, %v2093_v61  ;;  %v2549_v56 = vld [vmem:[#allocation3 + $0xc8] sm:$0xff]  ;;  %v2551_v61 = vld [vmem:[#allocation3 + $0xd8] sm:$0xff] }
 0xd34   :  { %v2113_v5 = vmax.f32 %v2111_v59, 0.0  ;;  %v4552_v57 = vpack.c.bf16 %v2549_v56, %v2548_v54  ;;  %v2550_v59 = vld [vmem:[#allocation3 + $0xd0] sm:$0xff] }
 0xd35   :  { %v2112_v3 = vmax.f32 %v2110_v0, 0.0  ;;  %v4555_v62 = vpack.c.bf16 %v2551_v61, %v2550_v59  ;;  %v3474_v0 = vld [vmem:[%s5424_s13 + $0x2] ss:$0 sm:$0xff]  ;;  %v3043_v56 = vld [vmem:[#allocation9 + $0xd0] sm:$0xff] }
 0xd36   :  { %v3045_v61 = vld [vmem:[#allocation9 + $0xe0] sm:$0xff] }
 0xd37   :  { %4097 = vmatprep.mubr.msk.f32.mxu1 %vm279_vm3, %v2112_v3 }
 0xd38   :  { %4098 = vmatmul.mubr.msk.f32.vlgmr.msra.gmra.mrb[22].mxu1 %vm279_vm3, %v2113_v5  ;;  %v2630_v5 = vld [vmem:[#allocation6 + $0xc0] sm:$0xff] }
 0xd39   :  { %4529 = vmatpush3.bf16.msra.mxu1 %v4528_v4  ;;  %4142 = vmatprep.mubr.msk.f32.mxu1 %vm4838_vm0, %v4837_v1 }
 0xd3a   :  { %4530 = vmatprep.subr.bf16.mxu1 %v4839_v2 }
 0xd3d   :  { %4532 = vmatpush3.bf16.msra.mxu1 %v4531_v8  ;;  %v4564_v8 = vpack.c.bf16 %v2631_v6, %v2630_v5  ;;  %v3487_v5 = vld [vmem:[%s5421_s10 + $0x3] ss:$0 sm:$0xff] }
 0xd3e   :  { %4533 = vmatprep.subr.bf16.mxu1 %v4839_v2 }
 0xd41   :  { %4535 = vmatpush3.bf16.msra.mxu1 %v4534_v11  ;;  %v2633_v11 = vld [vmem:[#allocation6 + $0xd8] sm:$0xff] }
 0xd42   :  { %4536 = vmatprep.subr.bf16.mxu1 %v4839_v2  ;;  %v4567_v12 = vpack.c.bf16 %v2633_v11, %v2632_v10 }
 0xd45   :  { %4538 = vmatpush3.bf16.msra.mxu1 %v4537_v14  ;;  %v2553_v14 = vld [vmem:[#allocation3 + $0xe8] sm:$0xff] }
 0xd46   :  { %4551 = vmatprep.subr.bf16.mxu1 %v4839_v2 }
 0xd48   :  { %4143 = vmatmul.mubr.msk.f32.vlgmr.msra.gmra.mrb[24].mxu1 %vm279_vm3, %v5243_v38 }
 0xd49   :  { %4180 = vmatprep.mubr.msk.f32.mxu1 %vm4838_vm0, %v4837_v1  ;;  %4553 = vmatpush3.bf16.msra.mxu1 %v4552_v57  ;;  %v3044_v57 = vld [vmem:[#allocation9 + $0xd8] sm:$0xff] }
 0xd4a   :  { %4554 = vmatprep.subr.bf16.mxu1 %v4839_v2  ;;  %v4610_v59 = vpack.c.bf16 %v3044_v57, %v3043_v56  ;;  %v3496_v57 = vld [vmem:[%s5426_s15 + $0x3] ss:$0 sm:$0xff] }
 0xd4d   :  { %4556 = vmatpush3.bf16.msra.mxu1 %v4555_v62  ;;  %v3046_v62 = vld [vmem:[#allocation9 + $0xe8] sm:$0xff] }
 0xd4e   :  { %4557 = vmatprep.subr.bf16.mxu1 %v4839_v2 }
 0xe0b   :  { %v4099_v16 = vpop.f32.mrb[22].mxu1 }
 0xe0c   :  { %v2209_v17 = vadd.f32 %v4099_v16, %v3467_v15  ;;  %v2203_v18 = vpop.f32.mrb[23].mxu1  ;;  %v4558_v16 = vpack.c.bf16 %v2553_v14, %v2552_v13  ;;  %v3051_v13 = vld [vmem:[#allocation11 + $0xc8] sm:$0xff] }
 0xe0d   :  { %v2204_v19 = vadd.f32 %v3467_v15, %v2203_v18  ;;  %v2634_v15 = vld [vmem:[#allocation6 + $0xe0] sm:$0xff] }
 0xe0e   :  { %v2213_v20 = vmax.f32 %v2209_v17, 0.0  ;;  %v2635_v17 = vld [vmem:[#allocation6 + $0xe8] sm:$0xff]  ;;  %4559 = vmatpush3.bf16.msra.mxu1 %v4558_v16  ;;  %v3052_v16 = vld [vmem:[#allocation11 + $0xd0] sm:$0xff] }
 0xe0f   :  { %v2212_v21 = vmax.f32 %v2204_v19, 0.0  ;;  %v4570_v18 = vpack.c.bf16 %v2635_v17, %v2634_v15  ;;  %4560 = vmatprep.subr.bf16.mxu1 %v4839_v2  ;;  %v2554_v19 = vld [vmem:[#allocation3 + $0xf0] sm:$0xff]  ;;  %v3053_v17 = vld [vmem:[#allocation11 + $0xd8] sm:$0xff] }
 0xe11   :  { %v4513_v24 = vpack.c.bf16 %v2213_v20, %v2212_v21  ;;  %v2555_v20 = vld [vmem:[#allocation3 + $0xf8] sm:$0xff]  ;;  %v2636_v21 = vld [vmem:[#allocation6 + $0xf0] sm:$0xff] }
 0xe12   :  { %v4561_v22 = vpack.c.bf16 %v2555_v20, %v2554_v19  ;;  %v3054_v19 = vld [vmem:[#allocation11 + $0xe0] sm:$0xff]  ;;  %v3055_v20 = vld [vmem:[#allocation11 + $0xe8] sm:$0xff] }
 0xe13   :  { %4514 = vmatpush3.bf16.msra.mxu0 %v4513_v24  ;;  %v4573_v24 = vpack.c.bf16 %v2637_v23, %v2636_v21 }
 0xe14   :  { %4515 = vmatprep.subr.bf16.mxu0 %v4839_v2  ;;  %4562 = vmatpush3.bf16.msra.mxu1 %v4561_v22  ;;  %v4601_v22 = vpack.c.bf16 %v3055_v20, %v3054_v19 }
 0xe16   :  { %4105 = vmatmul.mubr.msk.f32.vlgmr.msra.gmra.mrb[20].mxu0 %vm703_vm10, %v5141_v33 }
 0xe17   :  { %4517 = vmatpush3.bf16.msra.mxu0 %v4516_v25  ;;  %4123 = vmatprep.mubr.msk.f32.mxu0 %vm4838_vm0, %v4837_v1  ;;  %v3476_v25 = vld [vmem:[%s5426_s15 + $0x2] ss:$0 sm:$0xff] }
 0xe18   :  { %4518 = vmatprep.subr.bf16.mxu0 %v4839_v2 }
 0xe1b   :  { %v2441_v31 = vpop.f32.mrb[24].mxu1  ;;  %4520 = vmatpush3.bf16.msra.mxu0 %v4519_v28 }
 0xe1c   :  { %v4144_v35 = vpop.f32.mrb[25].mxu1  ;;  %4521 = vmatprep.subr.bf16.mxu0 %v4839_v2 }
 0xe1d   :  { %v2873_v35 = vld [vmem:[#allocation8 + $0xd0] sm:$0xff] }
 0xe1f   :  { %4523 = vmatpush3.bf16.msra.mxu0 %v4522_v32  ;;  %v2872_v32 = vld [vmem:[#allocation8 + $0xc8] sm:$0xff] }
 0xe20   :  { %4524 = vmatprep.subr.bf16.mxu0 %v4839_v2 }
 0xe23   :  { %4526 = vmatpush3.bf16.msra.mxu0 %v4525_v39  ;;  %v4579_v39 = vpack.c.bf16 %v2874_v36, %v2873_v35  ;;  %v3216_v36 = vld [vmem:[#allocation12 + $0xe0] sm:$0xff] }
 0xe24   :  { %4539 = vmatprep.subr.bf16.mxu0 %v4839_v2 }
 0xee9   :  { %v2280_v47 = vpop.f32.mrb[20].mxu0 }
 0xeea   :  { %v4106_v37 = vpop.f32.mrb[21].mxu0  ;;  %4124 = vmatmul.mubr.msk.f32.vlgmr.msra.gmra.mrb[22].mxu0 %vm279_vm3, %v2280_v47 }
 0xeeb   :  { %4541 = vmatpush3.bf16.msra.mxu0 %v4540_v44  ;;  %4161 = vmatprep.mubr.msk.f32.mxu0 %vm4838_vm0, %v4837_v1  ;;  %v2878_v37 = vld [vmem:[#allocation8 + $0xf8] sm:$0xff] }
 0xeec   :  { %4542 = vmatprep.subr.bf16.mxu0 %v4839_v2 }
 0xeef   :  { %4544 = vmatpush3.bf16.msra.mxu0 %v4543_v40 }
 0xef0   :  { %4545 = vmatprep.subr.bf16.mxu0 %v4839_v2 }
 0xef3   :  { %4547 = vmatpush3.bf16.msra.mxu0 %v4546_v50  ;;  %v3041_v50 = vld [vmem:[#allocation9 + $0xc0] sm:$0xff] }
 0xef4   :  { %4548 = vmatprep.subr.bf16.mxu0 %v4839_v2 }
 0xef7   :  { %4550 = vmatpush3.bf16.msra.mxu0 %v4549_v53  ;;  %v4607_v53 = vpack.c.bf16 %v3042_v51, %v3041_v50  ;;  %v3315_v51 = vld [vmem:[%s5427_s16 + $0x20] sm:$0xff] }
 0xef8   :  { %4563 = vmatprep.subr.bf16.mxu0 %v4839_v2 }
 0xfbd   :  { %v2371_v63 = vpop.f32.mrb[22].mxu0 }
 0xfbe   :  { %v2442_v3 = vadd.f32 %v2441_v31, %v2371_v63  ;;  %v4125_v4 = vpop.f32.mrb[23].mxu0  ;;  %v2871_v31 = vld [vmem:[#allocation8 + $0xc0] sm:$0xff]  ;;  %v4613_v63 = vpack.c.bf16 %v3046_v62, %v3045_v61 }
 0xfbf   :  { %v4575_v34 = vpack.c.bf16 %v2872_v32, %v2871_v31  ;;  %v3215_v31 = vld [vmem:[#allocation12 + $0xd8] sm:$0xff] }
 0xfc0   :  { %v2453_v7 = vadd.f32 %v3474_v0, %v2442_v3  ;;  %v3047_v0 = vld [vmem:[#allocation9 + $0xf0] sm:$0xff]  ;;  %v3048_v3 = vld [vmem:[#allocation9 + $0xf8] sm:$0xff] }
 0xfc1   :  { %v4616_v4 = vpack.c.bf16 %v3048_v3, %v3047_v0 }
 0xfc2   :  { %v2454_v9 = vmax.f32 %v2453_v7, 0.0 }
 0xfc4   :  { %4162 = vmatmul.mubr.msk.f32.vlgmr.msra.gmra.mrb[24].mxu0 %vm279_vm3, %v2454_v9 }
 0xfc5   :  { %4565 = vmatpush3.bf16.msra.mxu0 %v4564_v8  ;;  %4199 = vmatprep.mubr.msk.f32.mxu0 %vm4838_vm0, %v4837_v1 }
 0xfc6   :  { %4566 = vmatprep.subr.bf16.mxu0 %v4839_v2 }
 0xfc9   :  { %4568 = vmatpush3.bf16.msra.mxu0 %v4567_v12  ;;  %v3050_v12 = vld [vmem:[#allocation11 + $0xc0] sm:$0xff] }
 0xfca   :  { %4569 = vmatprep.subr.bf16.mxu0 %v4839_v2  ;;  %v4595_v15 = vpack.c.bf16 %v3051_v13, %v3050_v12 }
 0xfcd   :  { %4571 = vmatpush3.bf16.msra.mxu0 %v4570_v18  ;;  %v4598_v18 = vpack.c.bf16 %v3053_v17, %v3052_v16 }
 0xfce   :  { %4572 = vmatprep.subr.bf16.mxu0 %v4839_v2 }
 0xfd1   :  { %4574 = vmatpush3.bf16.msra.mxu0 %v4573_v24  ;;  %v3056_v24 = vld [vmem:[#allocation11 + $0xf0] sm:$0xff] }
 0xfd2   :  { %4576 = vmatprep.subr.bf16.mxu0 %v4575_v34 }
0x1097   :  { %v2541_v26 = vpop.f32.mrb[24].mxu0 }
0x1098   :  { %v2542_v27 = vadd.f32 %v3476_v25, %v2541_v26  ;;  %v4163_v28 = vpop.f32.mrb[25].mxu0  ;;  %v3057_v25 = vld [vmem:[#allocation11 + $0xf8] sm:$0xff] }
0x1099   :  { %v4604_v26 = vpack.c.bf16 %v3057_v25, %v3056_v24 }
0x109a   :  { %v2545_v29 = vmax.f32 %v2542_v27, 0.0  ;;  %v3213_v27 = vld [vmem:[#allocation12 + $0xc8] sm:$0xff] }
0x109c   :  { %v5311_v30 = vadd.f32 %v2545_v29, %v5243_v38  ;;  %v4583_v38 = vpack.c.bf16 %v2876_v43, %v2875_v42  ;;  %v3214_v29 = vld [vmem:[#allocation12 + $0xd0] sm:$0xff] }
0x109d   :  { %v3218_v43 = vld [vmem:[#allocation12 + $0xf0] sm:$0xff] }
0x109e   :  { %4181 = vmatmul.mubr.msk.f32.vlgmr.msra.gmra.mrb[26].mxu1 %vm279_vm3, %v5311_v30  ;;  %4200 = vmatmul.mubr.msk.f32.vlgmr.msra.gmra.mrb[26].mxu0 %vm279_vm3, %v5311_v30 }
0x109f   :  { %4204 = vmatprep.mubr.msk.f32.mxu1 %vm431_vm4, %v5095_v41  ;;  %4578 = vmatpush3.bf16.msra.mxu0 %v4575_v34  ;;  %v2877_v41 = vld [vmem:[#allocation8 + $0xf0] sm:$0xff]  ;;  %v4622_v34 = vpack.c.bf16 %v3215_v31, %v3214_v29 }
0x10a0   :  { %4580 = vmatprep.subr.bf16.mxu0 %v4579_v39  ;;  %v4587_v40 = vpack.c.bf16 %v2878_v37, %v2877_v41 }
0x10a3   :  { %4582 = vmatpush3.bf16.msra.mxu0 %v4579_v39  ;;  %v3217_v39 = vld [vmem:[#allocation12 + $0xe8] sm:$0xff] }
0x10a4   :  { %4584 = vmatprep.subr.bf16.mxu0 %v4583_v38  ;;  %v4625_v42 = vpack.c.bf16 %v3217_v39, %v3216_v36 }
0x10a7   :  { %4586 = vmatpush3.bf16.msra.mxu0 %v4583_v38  ;;  %v3219_v38 = vld [vmem:[#allocation12 + $0xf8] sm:$0xff] }
0x10a8   :  { %4588 = vmatprep.subr.bf16.mxu0 %v4587_v40 }
0x10ab   :  { %4590 = vmatpush3.bf16.msra.mxu0 %v4587_v40  ;;  %v3311_v40 = vld [vmem:[%s5427_s16] sm:$0xff] }
0x10ac   :  { %4606 = vmatprep.subr.bf16.mxu0 %v4839_v2 }
0x1171   :  { %v2625_v44 = vpop.f32.mrb[26].mxu1  ;;  %v2704_v45 = vpop.f32.mrb[26].mxu0 }
0x1172   :  { %v4182_v46 = vpop.f32.mrb[27].mxu1  ;;  %v4201_v47 = vpop.f32.mrb[27].mxu0  ;;  %4202 = vmatprep.subr.mxu1 %v2704_v45 }
0x1173   :  { %4203 = vmatpush3.msra.mxu1 %v2704_v45 }
0x1174   :  { %4205 = vmatmul.mubr.msk.f32.vlgmr.msra.gmra.mrb[28].mxu1 %vm431_vm4, %v5103_v58  ;;  %4207 = vmatprep.subr.mxu1 %v2625_v44  ;;  %v3485_v58 = vld [vmem:[%s5419_s8 + $0x3] ss:$0 sm:$0xff] }
0x1175   :  { %4208 = vmatpush3.msra.mxu1 %v2625_v44  ;;  %4209 = vmatprep.mubr.msk.f32.mxu1 %vm431_vm4, %v5100_v55  ;;  %v4628_v44 = vpack.c.bf16 %v3219_v38, %v3218_v43 }
0x1176   :  { %4591 = vmatprep.subr.bf16.mxu1 %v4839_v2 }
0x117c   :  { %4210 = vmatmul.mubr.msk.f32.vlgmr.msra.gmra.mrb[28].mxu1 %vm431_vm4, %v5111_v60 }
0x117d   :  { %4235 = vmatprep.mubr.msk.f32.mxu1 %vm4838_vm0, %v4837_v1 }
0x124f   :  { %v4211_v55 = vpop.f32.mrb[28].mxu1 }
0x1250   :  { %v2867_v48 = vadd.f32 %v4211_v55, %v3485_v58  ;;  %v2849_v49 = vpop.f32.mrb[29].mxu1 }
0x1251   :  { %v2866_v60 = vadd.f32 %v3485_v58, %v2849_v49  ;;  %v3312_v58 = vld [vmem:[%s5427_s16 + $0x8] sm:$0xff]  ;;  %v3314_v49 = vld [vmem:[%s5427_s16 + $0x18] sm:$0xff] }
0x1252   :  { %v2869_v54 = vmax.f32 %v2867_v48, 0.0  ;;  %v4631_v55 = vpack.c.bf16 %v3312_v58, %v3311_v40  ;;  %v3313_v48 = vld [vmem:[%s5427_s16 + $0x10] sm:$0xff] }
0x1253   :  { %v2868_v52 = vmax.f32 %v2866_v60, 0.0  ;;  %v4634_v50 = vpack.c.bf16 %v3314_v49, %v3313_v48  ;;  %v3316_v60 = vld [vmem:[%s5427_s16 + $0x28] sm:$0xff] }
0x1255   :  { %4228 = vmatprep.mubr.msk.f32.mxu0 %vm279_vm3, %v2868_v52  ;;  %v4637_v52 = vpack.c.bf16 %v3316_v60, %v3315_v51 }
0x1256   :  { %4229 = vmatmul.mubr.msk.f32.vlgmr.msra.gmra.mrb[28].mxu0 %vm279_vm3, %v2869_v54  ;;  %v3318_v54 = vld [vmem:[%s5427_s16 + $0x38] sm:$0xff] }
0x1257   :  { %4608 = vmatpush3.bf16.msra.mxu0 %v4607_v53  ;;  %4273 = vmatprep.mubr.msk.f32.mxu0 %vm4838_vm0, %v4837_v1  ;;  %v3317_v53 = vld [vmem:[%s5427_s16 + $0x30] sm:$0xff]  ;;  %s4841_s16 = smov [#allocation14]  }
0x1258   :  { %4609 = vmatprep.subr.bf16.mxu0 %v4839_v2  ;;  %v4640_v56 = vpack.c.bf16 %v3318_v54, %v3317_v53  ;;  %s3401_s15 = sshll.u32 %s4841_s16, 4  ;;  %s3402_s15 = int_to_ptr.vmem [resolvable:$true] %s3401_s15 }
0x1259   :  { %s4797_s1 = scalar_lea.vmem %s3402_s15, 16  ;;  %s4801_s20 = scalar_lea.vmem %s3402_s15, 32 }
0x125a   :  { %p4798_p6 = scmp.ne.s32.totalorder %s3402_s15, %s4797_s1  ;;  %p4802_p7 = scmp.lt.s32.totalorder %s3402_s15, %s3402_s15 }
0x125b   :  { %4611 = vmatpush3.bf16.msra.mxu0 %v4610_v59  ;;  %p4803_p8 = scmp.lt.s32.totalorder %s4801_s20, %s4797_s1 }
0x125c   :  { %4612 = vmatprep.subr.bf16.mxu0 %v4839_v2 }
0x125d   :  { %p4804_p9 = por %p4803_p8, %p4802_p7 }
0x125f   :  { %4614 = vmatpush3.bf16.msra.mxu0 %v4613_v63  ;;  %p4805_p10 = pnand %p4804_p9, %p4798_p6 }
0x1260   :  { %4615 = vmatprep.subr.bf16.mxu0 %v4839_v2 }
0x1263   :  { %4617 = vmatpush3.bf16.msra.mxu0 %v4616_v4 }
0x1264   :  { %4630 = vmatprep.subr.bf16.mxu0 %v4839_v2 }
0x1266   :  { %4274 = vmatmul.mubr.msk.f32.vlgmr.msra.gmra.mrb[30].mxu0 %vm279_vm3, %v5311_v30 }
0x1267   :  { %4311 = vmatprep.mubr.msk.f32.mxu0 %vm4838_vm0, %v4837_v1  ;;  %4632 = vmatpush3.bf16.msra.mxu0 %v4631_v55 }
0x1268   :  { %4633 = vmatprep.subr.bf16.mxu0 %v4839_v2 }
0x126b   :  { %4635 = vmatpush3.bf16.msra.mxu0 %v4634_v50 }
0x126c   :  { %4636 = vmatprep.subr.bf16.mxu0 %v4839_v2 }
0x126f   :  { %4638 = vmatpush3.bf16.msra.mxu0 %v4637_v52 }
0x1270   :  { %4639 = vmatprep.subr.bf16.mxu0 %v4839_v2 }
0x1273   :  { %4641 = vmatpush3.bf16.msra.mxu0 %v4640_v56 }
0x1329   :  { %v4230_v6 = vpop.f32.mrb[28].mxu0 }
0x132a   :  { %v2965_v7 = vadd.f32 %v4230_v6, %v3487_v5  ;;  %v2959_v8 = vpop.f32.mrb[29].mxu0 }
0x132b   :  { %v2960_v9 = vadd.f32 %v3487_v5, %v2959_v8 }
0x132c   :  { %v2969_v10 = vmax.f32 %v2965_v7, 0.0 }
0x132d   :  { %v2968_v11 = vmax.f32 %v2960_v9, 0.0 }
0x132f   :  { %v4592_v14 = vpack.c.bf16 %v2969_v10, %v2968_v11  ;;  %v3319_v10 = vld [vmem:[#allocation2] sm:$0x1] }
0x1331   :  { %4593 = vmatpush3.bf16.msra.mxu1 %v4592_v14 }
0x1332   :  { %4594 = vmatprep.subr.bf16.mxu1 %v4839_v2 }
0x1334   :  { %4236 = vmatmul.mubr.msk.f32.vlgmr.msra.gmra.mrb[30].mxu1 %vm703_vm10, %v5141_v33  ;;  %v3212_v33 = vld [vmem:[#allocation12 + $0xc0] sm:$0xff] }
0x1335   :  { %4596 = vmatpush3.bf16.msra.mxu1 %v4595_v15  ;;  %4254 = vmatprep.mubr.msk.f32.mxu1 %vm4838_vm0, %v4837_v1  ;;  %v4619_v28 = vpack.c.bf16 %v3213_v27, %v3212_v33 }
0x1336   :  { %4597 = vmatprep.subr.bf16.mxu1 %v4839_v2 }
0x1339   :  { %v3197_v21 = vpop.f32.mrb[30].mxu0  ;;  %4599 = vmatpush3.bf16.msra.mxu1 %v4598_v18 }
0x133a   :  { %v4275_v23 = vpop.f32.mrb[31].mxu0  ;;  %4600 = vmatprep.subr.bf16.mxu1 %v4839_v2 }
0x133d   :  { %4602 = vmatpush3.bf16.msra.mxu1 %v4601_v22 }
0x133e   :  { %4603 = vmatprep.subr.bf16.mxu1 %v4839_v2 }
0x1341   :  { %4605 = vmatpush3.bf16.msra.mxu1 %v4604_v26 }
0x1342   :  { %4618 = vmatprep.subr.bf16.mxu1 %v4839_v2 }
0x1407   :  { %v3036_v32 = vpop.f32.mrb[30].mxu1 }
0x1408   :  { %4255 = vmatmul.mubr.msk.f32.vlgmr.msra.gmra.mrb[32].mxu1 %vm279_vm3, %v3036_v32  ;;  %v4237_v35 = vpop.f32.mrb[31].mxu1 }
0x1409   :  { %4620 = vmatpush3.bf16.msra.mxu1 %v4619_v28  ;;  %4292 = vmatprep.mubr.msk.f32.mxu1 %vm4838_vm0, %v4837_v1  ;;  %v3494_v1 = vld [vmem:[%s5424_s13 + $0x3] ss:$0 sm:$0xff] }
0x140a   :  { %4621 = vmatprep.subr.bf16.mxu1 %v4839_v2 }
0x140d   :  { %4623 = vmatpush3.bf16.msra.mxu1 %v4622_v34 }
0x140e   :  { %4624 = vmatprep.subr.bf16.mxu1 %v4839_v2 }
0x1411   :  { %4626 = vmatpush3.bf16.msra.mxu1 %v4625_v42 }
0x1412   :  { %4627 = vmatprep.subr.bf16.mxu1 %v4839_v2 }
0x1415   :  { %4629 = vmatpush3.bf16.msra.mxu1 %v4628_v44 }
0x14db   :  { %v3127_v45 = vpop.f32.mrb[32].mxu1 }
0x14dc   :  { %v3198_v46 = vadd.f32 %v3197_v21, %v3127_v45  ;;  %v4256_v47 = vpop.f32.mrb[33].mxu1 }
0x14de   :  { %v3209_v41 = vadd.f32 %v3494_v1, %v3198_v46 }
0x14e0   :  { %v3210_v37 = vmax.f32 %v3209_v41, 0.0 }
0x14e2   :  { %4293 = vmatmul.mubr.msk.f32.vlgmr.msra.gmra.mrb[34].mxu1 %vm279_vm3, %v3210_v37 }
0x15b5   :  { %v3297_v59 = vpop.f32.mrb[34].mxu1 }
0x15b6   :  { %v3298_v61 = vadd.f32 %v3496_v57, %v3297_v59  ;;  %v4294_v62 = vpop.f32.mrb[35].mxu1 }
0x15b8   :  { %v3301_v63 = vmax.f32 %v3298_v61, 0.0 }
0x15ba   :  { %v3302_v2 = vadd.f32 %v3301_v63, %v5311_v30 }
0x15bc   :  { %v3303_v0 = vsel %vm279_vm3, %v3302_v2, 0.0 }
0x15bd   :  { %v3304_v3 = vrot.slane %v3303_v0, 4 }
0x15bf   :  { %v3305_v4 = vadd.f32 %v3304_v3, %v3303_v0 }
0x15c1   :  { %v3306_v5 = vrot.slane %v3305_v4, 2 }
0x15c3   :  { %v3307_v6 = vadd.f32 %v3306_v5, %v3305_v4 }
0x15c5   :  { %v3308_v7 = vrot.slane %v3307_v6, 1 }
0x15c7   :  { %v3309_v8 = vadd.f32 %v3308_v7, %v3307_v6 }
0x15c9   :  { %v3310_v9 = vmul.f32 0.125, %v3309_v8 }
0x15cb   :  { %4312 = vmatmul.mubr.msk.f32.vlgmr.msra.gmra.mrb[32].mxu0 %vm279_vm3, %v3310_v9 }
0x169e   :  { %v3389_v11 = vpop.f32.mrb[32].mxu0 }
0x169f   :  { %v3390_v12 = vadd.f32 %v3389_v11, %v3319_v10  ;;  %v4313_v13 = vpop.f32.mrb[33].mxu0 }
0x16a1   :  { %3394 = vst.msk [vmem:[#allocation14] sm:$0x1] %vm3393_vm11, %v3390_v12 }
0x16a2   :  { %4808 = shalt.err (!%p4805_p10)
}
0x16a3   :  { %s4809_s24 = scalar_lea.hbm %s5429_s18, 16 }
0x16a4   :  { %p4810_p11 = scmp.ne.s32.totalorder %s5429_s18, %s4809_s24  ;;  %p4813_p12 = scmp.lt.u32.totalorder %s4809_s24, %s5429_s18 }
0x16a6   :  { %p4815_p13 = pnand %p4813_p12, %p4810_p11 }
0x16a8   :  { %4818 = shalt.err (!%p4815_p13)
}
0x16a9   :  { %3404 = dma.vmem_to_hbm [thread:$0]  %s3402_s15, 16, %s5429_s18, [#allocation5]  }
0x16aa   :  { %4827 = dma.done.wait [#allocation5], 16  }
0x16ab   :  { %4828 = vsyncadd [#allocation5], 4294967280 }
0x16ac   :  { %3408 = vsyncpa [#allocation4], 1 }
0x16ad   :  { %3409 = vsyncpa [#allocation7], 1 }
0x16ae   :  { %3410 = vsyncpa [#allocation10], 1 }
0x16af   :  { %3411 = vsyncpa [#allocation13], 1 }
0x16b0   :  { %3412 = vsyncpa [#allocation5], 1 }

</bundles_post_ra>
